<compile_context>
chip_gen: v5e
topology: v5e:2x2
jax: 0.10.0
libtpu: 0.0.40
codegen_flags: <defaults>
</compile_context>

<pallas_src>
import functools
import math

import jax
import jax.numpy as jnp
from jax.experimental import pallas as pl
from jax.experimental.pallas import tpu as pltpu


def _layernorm(y, eps=1e-5):
    # Fresh nn.LayerNorm(d) constructed inside the PyTorch forward => gamma=1,
    # beta=0.  Statistics in f32; rsqrt goes to the EUP slot.
    mu = jnp.mean(y, axis=-1, keepdims=True)
    var = jnp.mean(jnp.square(y - mu), axis=-1, keepdims=True)
    return (y - mu) * jax.lax.rsqrt(var + eps)


def encoder_kernel(x_ref, wqkv_ref, bqkv_ref, wp_ref, bp_ref,
                   w1_ref, b1_ref, w2_ref, b2_ref, o_ref, *, num_heads):
    Bt, S, F = x_ref.shape               # block: Bt batch rows per grid step
    H = num_heads
    dh = F // H
    cdt = x_ref.dtype                    # MXU input dtype (f32 or bf16)

    x = x_ref[...]                       # (Bt, S, F)
    xf = x.reshape(Bt * S, F)            # fold batch into matmul rows

    # ---- fused QKV projection: single (Bt*S, F) x (F, 3F) MXU pass ----
    # 1/sqrt(dh) is already folded into the Q columns of wqkv/bqkv (wrapper).
    qkv = jnp.dot(xf, wqkv_ref[...], preferred_element_type=jnp.float32)
    qkv = (qkv + bqkv_ref[...].astype(jnp.float32)).astype(cdt)

    # ---- head-major relayout: one slice pass + ONE concatenate ----
    # qkv columns are already head-contiguous: [q_h0..q_hH-1, k_h0.., v_h..].
    # TODO(synk): replace with 4-D einsums once multi-batch-dim dot_general
    #             lowers reliably in Mosaic (single relayout inside dot_general).
    qkv3 = qkv.reshape(Bt, S, 3 * F)
    heads = jnp.concatenate(
        [qkv3[:, :, g * dh:(g + 1) * dh] for g in range(3 * H)],
        axis=0)                                            # (3*H*Bt, S, dh)
    qh = heads[0 * H * Bt:1 * H * Bt]     # leading-dim views: no lane relayout
    kh = heads[1 * H * Bt:2 * H * Bt]
    vh = heads[2 * H * Bt:3 * H * Bt]

    # ---- attention, batched over all (head, batch) pairs ----
    s = jnp.einsum('nqd,nkd->nqk', qh, kh,
                   preferred_element_type=jnp.float32)     # (H*Bt, S, S) f32
    m = jnp.max(s, axis=-1, keepdims=True)
    p = jnp.exp(s - m)                                     # unnormalized probs
    denom = jnp.sum(p, axis=-1, keepdims=True)             # (H*Bt, S, 1) f32
    ctx = jnp.einsum('nqk,nkd->nqd', p.astype(cdt), vh,
                     preferred_element_type=jnp.float32)   # (H*Bt, S, dh) f32
    # Normalize AFTER the PV matmul: O(S*dh) VALU multiply instead of O(S^2);
    # the reciprocal itself runs on the (free) EUP slot.
    ctx = ctx * pl.reciprocal(denom, approx=True)

    # merge heads back onto the lane axis: one concatenate
    attn = jnp.concatenate(
        [ctx[h * Bt:(h + 1) * Bt] for h in range(H)], axis=-1)  # (Bt, S, F)
    attn = attn.reshape(Bt * S, F).astype(cdt)

    # ---- output projection + residual + LayerNorm (f32 stats) ----
    proj = jnp.dot(attn, wp_ref[...], preferred_element_type=jnp.float32)
    proj = proj + bp_ref[...].astype(jnp.float32)
    x1 = _layernorm(proj + xf.astype(jnp.float32))         # (Bt*S, F) f32

    # ---- MLP + residual + LayerNorm ----
    h1 = jnp.dot(x1.astype(cdt), w1_ref[...], preferred_element_type=jnp.float32)
    h1 = jnp.maximum(h1 + b1_ref[...].astype(jnp.float32), 0.0)
    h2 = jnp.dot(h1.astype(cdt), w2_ref[...], preferred_element_type=jnp.float32)
    h2 = h2 + b2_ref[...].astype(jnp.float32)
    out = _layernorm(h2 + x1)

    o_ref[...] = out.reshape(Bt, S, F).astype(o_ref.dtype)


def _choose_block_batch(B, S, target_rows=512):
    """Largest divisor Bt of B with Bt*S <= max(target_rows, S).

    Targets ~512 rows per MXU pass (amortizes the ~0.35us/step overhead and
    feeds the 256-wide MXU on v6e) while ALWAYS leaving B//Bt >= 2 grid steps
    when B > 1, so the "parallel" batch axis can split across v7x's two
    TensorCores and the pipeline has more than one step to overlap.
    """
    cap_rows = max(target_rows, S)
    max_bt = B if B == 1 else B // 2
    best = 1
    for bt in range(1, max_bt + 1):
        if B % bt == 0 and bt * S <= cap_rows:
            best = bt
    return best


def _vmem_limit_bytes(default=48 * 1024 * 1024):
    """~75% of physical VMEM: 48 MiB on v7x (64 MiB/TC), 96 MiB on v5e/v6e
    (128 MiB).  Conservative 48 MiB fallback if the query is unavailable."""
    try:
        cap = int(pltpu.get_tpu_info().vmem_capacity_bytes)
    except Exception:
        return default
    return max(default, min(cap * 3 // 4, 112 * 1024 * 1024))


def encoder_forward(x, params, num_heads=4, compute_dtype=None, target_rows=512):
    """Encoder.forward (MHA -> MLP) as a single Pallas TPU kernel.

    compute_dtype=jnp.bfloat16 stores weights/activations in bf16 (recommended
    on v5e: halves HBM/VMEM bytes, bf16 MXU rate) while keeping f32
    accumulation and f32 softmax/LayerNorm statistics.
    """
    (wq, bq, wk, bk, wv, bv, wp, bp, w1, b1, w2, b2) = params
    B, S, F = x.shape
    dh = F // num_heads
    scale = 1.0 / math.sqrt(dh)

    # Fuse Q|K|V into one (F, 3F) weight / (1, 3F) bias; fold the attention
    # scale into the Q columns (exact up to rounding, zero in-kernel cost).
    wqkv = jnp.concatenate([wq * scale, wk, wv], axis=1)
    bqkv = jnp.concatenate([bq * scale, bk, bv], axis=1)
    weights = (wqkv, bqkv, wp, bp, w1, b1, w2, b2)

    if compute_dtype is not None:
        x = x.astype(compute_dtype)
        weights = tuple(w.astype(compute_dtype) for w in weights)

    Bt = _choose_block_batch(B, S, target_rows=target_rows)
    grid = (B // Bt,)

    io_spec = pl.BlockSpec((Bt, S, F), lambda b: (b, 0, 0))
    kernel = functools.partial(encoder_kernel, num_heads=num_heads)
    cparams = pltpu.CompilerParams(
        dimension_semantics=("parallel",),
        vmem_limit_bytes=_vmem_limit_bytes())

    def call(single_buffer_weights):
        # Weights/biases are grid-invariant (constant index_map): single-buffer
        # them so only the x / output blocks are double-buffered.
        if single_buffer_weights:
            w_specs = [pl.BlockSpec(w.shape, lambda b: (0, 0),
                                    pipeline_mode=pl.Buffered(1))
                       for w in weights]
        else:
            w_specs = [pl.BlockSpec(w.shape, lambda b: (0, 0)) for w in weights]
        return pl.pallas_call(
            kernel,
            out_shape=jax.ShapeDtypeStruct((B, S, F), x.dtype),
            grid=grid,
            in_specs=[io_spec] + w_specs,
            out_specs=io_spec,
            compiler_params=cparams,
        )(x, *weights)

    try:
        return call(single_buffer_weights=True)
    except Exception:
        # Some jax/Mosaic versions reject pipeline_mode=pl.Buffered(1); the
        # default double-buffered weight path is functionally identical.
        return call(single_buffer_weights=False)


def encoder_reference(x, params, num_heads=4):
    """Pure-JAX reference (independent of the kernel) for correctness check."""
    (wq, bq, wk, bk, wv, bv, wp, bp, w1, b1, w2, b2) = params
    B, S, F = x.shape
    dh = F // num_heads

    def ln(y, eps=1e-5):
        mu = jnp.mean(y, axis=-1, keepdims=True)
        var = jnp.mean((y - mu) ** 2, axis=-1, keepdims=True)
        return (y - mu) / jnp.sqrt(var + eps)

    q = x @ wq + bq
    k = x @ wk + bk
    v = x @ wv + bv
    q = q.reshape(B, S, num_heads, dh).transpose(0, 2, 1, 3)
    k = k.reshape(B, S, num_heads, dh).transpose(0, 2, 1, 3)
    v = v.reshape(B, S, num_heads, dh).transpose(0, 2, 1, 3)
    scores = jnp.einsum("bhqd,bhkd->bhqk", q, k) / math.sqrt(dh)
    p = jax.nn.softmax(scores, axis=-1)
    attn = jnp.einsum("bhqk,bhkd->bhqd", p, v).transpose(0, 2, 1, 3).reshape(B, S, F)
    x1 = ln(attn @ wp + bp + x)
    h = jax.nn.relu(x1 @ w1 + b1)
    return ln(h @ w2 + b2 + x1)


def init_params(key, features, mlp_factor=4):
    F = features
    Hd = mlp_factor * F
    ks = jax.random.split(key, 6)
    s = 0.05
    wq = jax.random.normal(ks[0], (F, F), jnp.float32) * s
    wk = jax.random.normal(ks[1], (F, F), jnp.float32) * s
    wv = jax.random.normal(ks[2], (F, F), jnp.float32) * s
    wp = jax.random.normal(ks[3], (F, F), jnp.float32) * s
    w1 = jax.random.normal(ks[4], (F, Hd), jnp.float32) * s
    w2 = jax.random.normal(ks[5], (Hd, F), jnp.float32) * s
    bq = jnp.zeros((1, F), jnp.float32)
    bk = jnp.full((1, F), 0.01, jnp.float32)
    bv = jnp.full((1, F), -0.01, jnp.float32)
    bp = jnp.zeros((1, F), jnp.float32)
    b1 = jnp.full((1, Hd), 0.02, jnp.float32)
    b2 = jnp.zeros((1, F), jnp.float32)
    return (wq, bq, wk, bk, wv, bv, wp, bp, w1, b1, w2, b2)


if __name__ == "__main__":
    # d_model = 128 keeps the output block lane-dense (last dim a multiple of
    # 128 lanes) while staying small; dh = 32, grid = (2,) so both TensorCores
    # get work on v7x.
    batch, seq, features, num_heads = 2, 8, 128, 4
    key = jax.random.PRNGKey(0)
    kx, kp = jax.random.split(key)
    x = jax.random.normal(kx, (batch, seq, features), jnp.float32)
    params = init_params(kp, features, mlp_factor=4)

    ref = encoder_reference(x, params, num_heads=num_heads)

    # f32 weights/activations (tight tolerance; approx reciprocal in softmax).
    out = encoder_forward(x, params, num_heads=num_heads)
    out = jax.block_until_ready(out)
    assert out.shape == (batch, seq, features)
    assert jnp.allclose(out, ref, atol=3e-3, rtol=3e-3), "f32 kernel mismatch vs reference"

    # bf16 storage/MXU path (f32 accumulation + f32 softmax/LN stats).
    out_bf16 = encoder_forward(x, params, num_heads=num_heads,
                               compute_dtype=jnp.bfloat16)
    out_bf16 = jax.block_until_ready(out_bf16)
    assert jnp.allclose(out_bf16.astype(jnp.float32), ref,
                        atol=5e-2, rtol=5e-2), "bf16 kernel mismatch vs reference"

    print("KERNEL_OK")
</pallas_src>

<mosaic_0001>
module attributes {stable_mosaic.version = 11 : i64} {
  func.func @encoder_kernel(%arg0: i32, %arg1: memref<1x8x128xf32, #tpu.memory_space<vmem>>, %arg2: memref<128x384xf32, #tpu.memory_space<vmem>>, %arg3: memref<1x384xf32, #tpu.memory_space<vmem>>, %arg4: memref<128x128xf32, #tpu.memory_space<vmem>>, %arg5: memref<1x128xf32, #tpu.memory_space<vmem>>, %arg6: memref<128x512xf32, #tpu.memory_space<vmem>>, %arg7: memref<1x512xf32, #tpu.memory_space<vmem>>, %arg8: memref<512x128xf32, #tpu.memory_space<vmem>>, %arg9: memref<1x128xf32, #tpu.memory_space<vmem>>, %arg10: memref<1x8x128xf32, #tpu.memory_space<vmem>>) attributes {dimension_semantics = [#tpu.dimension_semantics<parallel>], iteration_bounds = array<i64: 2>, scalar_prefetch = 0 : i64, scratch_operands = 0 : i64, tpu.core_type = #tpu.core_type<tc>, window_params = [{transform_indices = @transform_0, window_bounds = array<i64: 1, 8, 128>}, {pipeline_mode = #tpu.pipeline_mode<synchronous>, transform_indices = @transform_1, window_bounds = array<i64: 128, 384>}, {pipeline_mode = #tpu.pipeline_mode<synchronous>, transform_indices = @transform_2, window_bounds = array<i64: 1, 384>}, {pipeline_mode = #tpu.pipeline_mode<synchronous>, transform_indices = @transform_3, window_bounds = array<i64: 128, 128>}, {pipeline_mode = #tpu.pipeline_mode<synchronous>, transform_indices = @transform_4, window_bounds = array<i64: 1, 128>}, {pipeline_mode = #tpu.pipeline_mode<synchronous>, transform_indices = @transform_5, window_bounds = array<i64: 128, 512>}, {pipeline_mode = #tpu.pipeline_mode<synchronous>, transform_indices = @transform_6, window_bounds = array<i64: 1, 512>}, {pipeline_mode = #tpu.pipeline_mode<synchronous>, transform_indices = @transform_7, window_bounds = array<i64: 512, 128>}, {pipeline_mode = #tpu.pipeline_mode<synchronous>, transform_indices = @transform_8, window_bounds = array<i64: 1, 128>}, {transform_indices = @transform_9, window_bounds = array<i64: 1, 8, 128>}]} {
    %c0 = arith.constant 0 : index
    %c0_0 = arith.constant 0 : index
    %c0_1 = arith.constant 0 : index
    %0 = vector.load %arg1[%c0, %c0_0, %c0_1] : memref<1x8x128xf32, #tpu.memory_space<vmem>>, vector<1x8x128xf32>
    %1 = vector.shape_cast %0 : vector<1x8x128xf32> to vector<8x128xf32>
    %c0_2 = arith.constant 0 : index
    %c0_3 = arith.constant 0 : index
    %2 = vector.load %arg2[%c0_2, %c0_3] : memref<128x384xf32, #tpu.memory_space<vmem>>, vector<128x384xf32>
    %cst = arith.constant dense<0.000000e+00> : vector<8x384xf32>
    %3 = tpu.matmul %1, %2, %cst {dimension_numbers = #tpu.dot_dimension_numbers<[1], [0], [0], [1], [0, 0, 1, 1], [], []>} : vector<8x128xf32>, vector<128x384xf32>, vector<8x384xf32> -> vector<8x384xf32>
    %c0_4 = arith.constant 0 : index
    %c0_5 = arith.constant 0 : index
    %4 = vector.load %arg3[%c0_4, %c0_5] : memref<1x384xf32, #tpu.memory_space<vmem>>, vector<1x384xf32>
    %5 = vector.broadcast %4 : vector<1x384xf32> to vector<8x384xf32>
    %6 = arith.addf %3, %5 : vector<8x384xf32>
    %7 = vector.shape_cast %6 : vector<8x384xf32> to vector<1x8x384xf32>
    %8 = vector.extract_strided_slice %7 {offsets = [0, 0, 0], sizes = [1, 8, 32], strides = [1, 1, 1]} : vector<1x8x384xf32> to vector<1x8x32xf32>
    %9 = vector.extract_strided_slice %7 {offsets = [0, 0, 32], sizes = [1, 8, 32], strides = [1, 1, 1]} : vector<1x8x384xf32> to vector<1x8x32xf32>
    %10 = vector.extract_strided_slice %7 {offsets = [0, 0, 64], sizes = [1, 8, 32], strides = [1, 1, 1]} : vector<1x8x384xf32> to vector<1x8x32xf32>
    %11 = vector.extract_strided_slice %7 {offsets = [0, 0, 96], sizes = [1, 8, 32], strides = [1, 1, 1]} : vector<1x8x384xf32> to vector<1x8x32xf32>
    %12 = vector.extract_strided_slice %7 {offsets = [0, 0, 128], sizes = [1, 8, 32], strides = [1, 1, 1]} : vector<1x8x384xf32> to vector<1x8x32xf32>
    %13 = vector.extract_strided_slice %7 {offsets = [0, 0, 160], sizes = [1, 8, 32], strides = [1, 1, 1]} : vector<1x8x384xf32> to vector<1x8x32xf32>
    %14 = vector.extract_strided_slice %7 {offsets = [0, 0, 192], sizes = [1, 8, 32], strides = [1, 1, 1]} : vector<1x8x384xf32> to vector<1x8x32xf32>
    %15 = vector.extract_strided_slice %7 {offsets = [0, 0, 224], sizes = [1, 8, 32], strides = [1, 1, 1]} : vector<1x8x384xf32> to vector<1x8x32xf32>
    %16 = vector.extract_strided_slice %7 {offsets = [0, 0, 256], sizes = [1, 8, 32], strides = [1, 1, 1]} : vector<1x8x384xf32> to vector<1x8x32xf32>
    %17 = vector.extract_strided_slice %7 {offsets = [0, 0, 288], sizes = [1, 8, 32], strides = [1, 1, 1]} : vector<1x8x384xf32> to vector<1x8x32xf32>
    %18 = vector.extract_strided_slice %7 {offsets = [0, 0, 320], sizes = [1, 8, 32], strides = [1, 1, 1]} : vector<1x8x384xf32> to vector<1x8x32xf32>
    %19 = vector.extract_strided_slice %7 {offsets = [0, 0, 352], sizes = [1, 8, 32], strides = [1, 1, 1]} : vector<1x8x384xf32> to vector<1x8x32xf32>
    %20 = tpu.concatenate %8, %9, %10, %11, %12, %13, %14, %15, %16, %17, %18, %19 in 0 : vector<1x8x32xf32>, vector<1x8x32xf32>, vector<1x8x32xf32>, vector<1x8x32xf32>, vector<1x8x32xf32>, vector<1x8x32xf32>, vector<1x8x32xf32>, vector<1x8x32xf32>, vector<1x8x32xf32>, vector<1x8x32xf32>, vector<1x8x32xf32>, vector<1x8x32xf32> -> vector<12x8x32xf32>
    %21 = vector.extract_strided_slice %20 {offsets = [0, 0, 0], sizes = [4, 8, 32], strides = [1, 1, 1]} : vector<12x8x32xf32> to vector<4x8x32xf32>
    %22 = vector.extract_strided_slice %20 {offsets = [4, 0, 0], sizes = [4, 8, 32], strides = [1, 1, 1]} : vector<12x8x32xf32> to vector<4x8x32xf32>
    %23 = vector.extract_strided_slice %20 {offsets = [8, 0, 0], sizes = [4, 8, 32], strides = [1, 1, 1]} : vector<12x8x32xf32> to vector<4x8x32xf32>
    "tpu.trace_start"() <{level = 10 : i32, message = "nqd,nkd->nqk"}> : () -> ()
    %cst_6 = arith.constant dense<0.000000e+00> : vector<4x8x8xf32>
    %24 = tpu.matmul %21, %22, %cst_6 {dimension_numbers = #tpu.dot_dimension_numbers<[2], [2], [1], [1], [0, 0, 0, 1, 1, 1], [0], [0]>} : vector<4x8x32xf32>, vector<4x8x32xf32>, vector<4x8x8xf32> -> vector<4x8x8xf32>
    "tpu.trace_stop"() : () -> ()
    %cst_7 = arith.constant dense<0xFF800000> : vector<4x8xf32>
    %25 = vector.multi_reduction <maximumf>, %24, %cst_7 [2] : vector<4x8x8xf32> to vector<4x8xf32>
    %26 = vector.shape_cast %25 : vector<4x8xf32> to vector<4x8x1xf32>
    %27 = vector.broadcast %26 : vector<4x8x1xf32> to vector<4x8x8xf32>
    %28 = arith.subf %24, %27 : vector<4x8x8xf32>
    %29 = math.exp %28 : vector<4x8x8xf32>
    %cst_8 = arith.constant dense<0.000000e+00> : vector<4x8xf32>
    %30 = vector.multi_reduction <add>, %29, %cst_8 [2] : vector<4x8x8xf32> to vector<4x8xf32>
    %31 = vector.shape_cast %30 : vector<4x8xf32> to vector<4x8x1xf32>
    "tpu.trace_start"() <{level = 10 : i32, message = "nqk,nkd->nqd"}> : () -> ()
    %cst_9 = arith.constant dense<0.000000e+00> : vector<4x8x32xf32>
    %32 = tpu.matmul %29, %23, %cst_9 {dimension_numbers = #tpu.dot_dimension_numbers<[2], [1], [1], [2], [0, 0, 0, 1, 1, 2], [0], [0]>} : vector<4x8x8xf32>, vector<4x8x32xf32>, vector<4x8x32xf32> -> vector<4x8x32xf32>
    "tpu.trace_stop"() : () -> ()
    %33 = tpu.reciprocal %31 {approx = true} : vector<4x8x1xf32> -> vector<4x8x1xf32>
    %34 = vector.broadcast %33 : vector<4x8x1xf32> to vector<4x8x32xf32>
    %35 = arith.mulf %32, %34 : vector<4x8x32xf32>
    %36 = vector.extract_strided_slice %35 {offsets = [0, 0, 0], sizes = [1, 8, 32], strides = [1, 1, 1]} : vector<4x8x32xf32> to vector<1x8x32xf32>
    %37 = vector.extract_strided_slice %35 {offsets = [1, 0, 0], sizes = [1, 8, 32], strides = [1, 1, 1]} : vector<4x8x32xf32> to vector<1x8x32xf32>
    %38 = vector.extract_strided_slice %35 {offsets = [2, 0, 0], sizes = [1, 8, 32], strides = [1, 1, 1]} : vector<4x8x32xf32> to vector<1x8x32xf32>
    %39 = vector.extract_strided_slice %35 {offsets = [3, 0, 0], sizes = [1, 8, 32], strides = [1, 1, 1]} : vector<4x8x32xf32> to vector<1x8x32xf32>
    %40 = tpu.concatenate %36, %37, %38, %39 in 2 : vector<1x8x32xf32>, vector<1x8x32xf32>, vector<1x8x32xf32>, vector<1x8x32xf32> -> vector<1x8x128xf32>
    %41 = vector.shape_cast %40 : vector<1x8x128xf32> to vector<8x128xf32>
    %c0_10 = arith.constant 0 : index
    %c0_11 = arith.constant 0 : index
    %42 = vector.load %arg4[%c0_10, %c0_11] : memref<128x128xf32, #tpu.memory_space<vmem>>, vector<128x128xf32>
    %cst_12 = arith.constant dense<0.000000e+00> : vector<8x128xf32>
    %43 = tpu.matmul %41, %42, %cst_12 {dimension_numbers = #tpu.dot_dimension_numbers<[1], [0], [0], [1], [0, 0, 1, 1], [], []>} : vector<8x128xf32>, vector<128x128xf32>, vector<8x128xf32> -> vector<8x128xf32>
    %c0_13 = arith.constant 0 : index
    %c0_14 = arith.constant 0 : index
    %44 = vector.load %arg5[%c0_13, %c0_14] : memref<1x128xf32, #tpu.memory_space<vmem>>, vector<1x128xf32>
    %45 = vector.broadcast %44 : vector<1x128xf32> to vector<8x128xf32>
    %46 = arith.addf %43, %45 : vector<8x128xf32>
    %47 = arith.addf %46, %1 : vector<8x128xf32>
    %cst_15 = arith.constant dense<0.000000e+00> : vector<8xf32>
    %48 = vector.multi_reduction <add>, %47, %cst_15 [1] : vector<8x128xf32> to vector<8xf32>
    %49 = vector.shape_cast %48 : vector<8xf32> to vector<8x1xf32>
    %cst_16 = arith.constant 1.280000e+02 : f32
    %50 = vector.broadcast %cst_16 : f32 to vector<8x1xf32>
    %51 = arith.divf %49, %50 : vector<8x1xf32>
    %52 = vector.broadcast %51 : vector<8x1xf32> to vector<8x128xf32>
    %53 = arith.subf %47, %52 : vector<8x128xf32>
    %54 = arith.mulf %53, %53 : vector<8x128xf32>
    %cst_17 = arith.constant dense<0.000000e+00> : vector<8xf32>
    %55 = vector.multi_reduction <add>, %54, %cst_17 [1] : vector<8x128xf32> to vector<8xf32>
    %56 = vector.shape_cast %55 : vector<8xf32> to vector<8x1xf32>
    %cst_18 = arith.constant 1.280000e+02 : f32
    %57 = vector.broadcast %cst_18 : f32 to vector<8x1xf32>
    %58 = arith.divf %56, %57 : vector<8x1xf32>
    %59 = vector.broadcast %51 : vector<8x1xf32> to vector<8x128xf32>
    %60 = arith.subf %47, %59 : vector<8x128xf32>
    %cst_19 = arith.constant 9.99999974E-6 : f32
    %61 = vector.broadcast %cst_19 : f32 to vector<8x1xf32>
    %62 = arith.addf %58, %61 : vector<8x1xf32>
    %63 = math.rsqrt %62 : vector<8x1xf32>
    %64 = vector.broadcast %63 : vector<8x1xf32> to vector<8x128xf32>
    %65 = arith.mulf %60, %64 : vector<8x128xf32>
    %c0_20 = arith.constant 0 : index
    %c0_21 = arith.constant 0 : index
    %66 = vector.load %arg6[%c0_20, %c0_21] : memref<128x512xf32, #tpu.memory_space<vmem>>, vector<128x512xf32>
    %cst_22 = arith.constant dense<0.000000e+00> : vector<8x512xf32>
    %67 = tpu.matmul %65, %66, %cst_22 {dimension_numbers = #tpu.dot_dimension_numbers<[1], [0], [0], [1], [0, 0, 1, 1], [], []>} : vector<8x128xf32>, vector<128x512xf32>, vector<8x512xf32> -> vector<8x512xf32>
    %c0_23 = arith.constant 0 : index
    %c0_24 = arith.constant 0 : index
    %68 = vector.load %arg7[%c0_23, %c0_24] : memref<1x512xf32, #tpu.memory_space<vmem>>, vector<1x512xf32>
    %69 = vector.broadcast %68 : vector<1x512xf32> to vector<8x512xf32>
    %70 = arith.addf %67, %69 : vector<8x512xf32>
    %cst_25 = arith.constant 0.000000e+00 : f32
    %71 = vector.broadcast %cst_25 : f32 to vector<8x512xf32>
    %72 = arith.maximumf %70, %71 : vector<8x512xf32>
    %c0_26 = arith.constant 0 : index
    %c0_27 = arith.constant 0 : index
    %73 = vector.load %arg8[%c0_26, %c0_27] : memref<512x128xf32, #tpu.memory_space<vmem>>, vector<512x128xf32>
    %cst_28 = arith.constant dense<0.000000e+00> : vector<8x128xf32>
    %74 = tpu.matmul %72, %73, %cst_28 {dimension_numbers = #tpu.dot_dimension_numbers<[1], [0], [0], [1], [0, 0, 1, 1], [], []>} : vector<8x512xf32>, vector<512x128xf32>, vector<8x128xf32> -> vector<8x128xf32>
    %c0_29 = arith.constant 0 : index
    %c0_30 = arith.constant 0 : index
    %75 = vector.load %arg9[%c0_29, %c0_30] : memref<1x128xf32, #tpu.memory_space<vmem>>, vector<1x128xf32>
    %76 = vector.broadcast %75 : vector<1x128xf32> to vector<8x128xf32>
    %77 = arith.addf %74, %76 : vector<8x128xf32>
    %78 = arith.addf %77, %65 : vector<8x128xf32>
    %cst_31 = arith.constant dense<0.000000e+00> : vector<8xf32>
    %79 = vector.multi_reduction <add>, %78, %cst_31 [1] : vector<8x128xf32> to vector<8xf32>
    %80 = vector.shape_cast %79 : vector<8xf32> to vector<8x1xf32>
    %cst_32 = arith.constant 1.280000e+02 : f32
    %81 = vector.broadcast %cst_32 : f32 to vector<8x1xf32>
    %82 = arith.divf %80, %81 : vector<8x1xf32>
    %83 = vector.broadcast %82 : vector<8x1xf32> to vector<8x128xf32>
    %84 = arith.subf %78, %83 : vector<8x128xf32>
    %85 = arith.mulf %84, %84 : vector<8x128xf32>
    %cst_33 = arith.constant dense<0.000000e+00> : vector<8xf32>
    %86 = vector.multi_reduction <add>, %85, %cst_33 [1] : vector<8x128xf32> to vector<8xf32>
    %87 = vector.shape_cast %86 : vector<8xf32> to vector<8x1xf32>
    %cst_34 = arith.constant 1.280000e+02 : f32
    %88 = vector.broadcast %cst_34 : f32 to vector<8x1xf32>
    %89 = arith.divf %87, %88 : vector<8x1xf32>
    %90 = vector.broadcast %82 : vector<8x1xf32> to vector<8x128xf32>
    %91 = arith.subf %78, %90 : vector<8x128xf32>
    %cst_35 = arith.constant 9.99999974E-6 : f32
    %92 = vector.broadcast %cst_35 : f32 to vector<8x1xf32>
    %93 = arith.addf %89, %92 : vector<8x1xf32>
    %94 = math.rsqrt %93 : vector<8x1xf32>
    %95 = vector.broadcast %94 : vector<8x1xf32> to vector<8x128xf32>
    %96 = arith.mulf %91, %95 : vector<8x128xf32>
    %97 = vector.shape_cast %96 : vector<8x128xf32> to vector<1x8x128xf32>
    %c0_36 = arith.constant 0 : index
    %c0_37 = arith.constant 0 : index
    %c0_38 = arith.constant 0 : index
    %98 = vector.load %arg10[%c0_36, %c0_37, %c0_38] : memref<1x8x128xf32, #tpu.memory_space<vmem>>, vector<1x8x128xf32>
    tpu.vector_store %arg10[%c0_36, %c0_37, %c0_38], %97 {strides = array<i32>} : memref<1x8x128xf32, #tpu.memory_space<vmem>>, vector<1x8x128xf32>,
    return
  }
  func.func @transform_0(%arg0: i32) -> (i32, i32, i32) {
    %c0_i32 = arith.constant 0 : i32
    %c0_i32_0 = arith.constant 0 : i32
    %c0_i32_1 = arith.constant 0 : i32
    return %arg0, %c0_i32, %c0_i32_0 : i32, i32, i32
  }
  func.func @transform_1(%arg0: i32) -> (i32, i32) {
    %c0_i32 = arith.constant 0 : i32
    %c0_i32_0 = arith.constant 0 : i32
    %c0_i32_1 = arith.constant 0 : i32
    return %c0_i32, %c0_i32_0 : i32, i32
  }
  func.func @transform_2(%arg0: i32) -> (i32, i32) {
    %c0_i32 = arith.constant 0 : i32
    %c0_i32_0 = arith.constant 0 : i32
    %c0_i32_1 = arith.constant 0 : i32
    return %c0_i32, %c0_i32_0 : i32, i32
  }
  func.func @transform_3(%arg0: i32) -> (i32, i32) {
    %c0_i32 = arith.constant 0 : i32
    %c0_i32_0 = arith.constant 0 : i32
    %c0_i32_1 = arith.constant 0 : i32
    return %c0_i32, %c0_i32_0 : i32, i32
  }
  func.func @transform_4(%arg0: i32) -> (i32, i32) {
    %c0_i32 = arith.constant 0 : i32
    %c0_i32_0 = arith.constant 0 : i32
    %c0_i32_1 = arith.constant 0 : i32
    return %c0_i32, %c0_i32_0 : i32, i32
  }
  func.func @transform_5(%arg0: i32) -> (i32, i32) {
    %c0_i32 = arith.constant 0 : i32
    %c0_i32_0 = arith.constant 0 : i32
    %c0_i32_1 = arith.constant 0 : i32
    return %c0_i32, %c0_i32_0 : i32, i32
  }
  func.func @transform_6(%arg0: i32) -> (i32, i32) {
    %c0_i32 = arith.constant 0 : i32
    %c0_i32_0 = arith.constant 0 : i32
    %c0_i32_1 = arith.constant 0 : i32
    return %c0_i32, %c0_i32_0 : i32, i32
  }
  func.func @transform_7(%arg0: i32) -> (i32, i32) {
    %c0_i32 = arith.constant 0 : i32
    %c0_i32_0 = arith.constant 0 : i32
    %c0_i32_1 = arith.constant 0 : i32
    return %c0_i32, %c0_i32_0 : i32, i32
  }
  func.func @transform_8(%arg0: i32) -> (i32, i32) {
    %c0_i32 = arith.constant 0 : i32
    %c0_i32_0 = arith.constant 0 : i32
    %c0_i32_1 = arith.constant 0 : i32
    return %c0_i32, %c0_i32_0 : i32, i32
  }
  func.func @transform_9(%arg0: i32) -> (i32, i32, i32) {
    %c0_i32 = arith.constant 0 : i32
    %c0_i32_0 = arith.constant 0 : i32
    %c0_i32_1 = arith.constant 0 : i32
    return %arg0, %c0_i32, %c0_i32_0 : i32, i32, i32
  }
}

module attributes {stable_mosaic.version = 11 : i64} {
  func.func @encoder_kernel(%arg0: i32, %arg1: memref<1x8x128xf32, #tpu.memory_space<vmem>>, %arg2: memref<128x384xf32, #tpu.memory_space<vmem>>, %arg3: memref<1x384xf32, #tpu.memory_space<vmem>>, %arg4: memref<128x128xf32, #tpu.memory_space<vmem>>, %arg5: memref<1x128xf32, #tpu.memory_space<vmem>>, %arg6: memref<128x512xf32, #tpu.memory_space<vmem>>, %arg7: memref<1x512xf32, #tpu.memory_space<vmem>>, %arg8: memref<512x128xf32, #tpu.memory_space<vmem>>, %arg9: memref<1x128xf32, #tpu.memory_space<vmem>>, %arg10: memref<1x8x128xf32, #tpu.memory_space<vmem>>) attributes {dimension_semantics = [#tpu.dimension_semantics<parallel>], iteration_bounds = array<i64: 2>, scalar_prefetch = 0 : i64, scratch_operands = 0 : i64, tpu.core_type = #tpu.core_type<tc>, window_params = [{transform_indices = @transform_0, window_bounds = array<i64: 1, 8, 128>}, {pipeline_mode = #tpu.pipeline_mode<synchronous>, transform_indices = @transform_1, window_bounds = array<i64: 128, 384>}, {pipeline_mode = #tpu.pipeline_mode<synchronous>, transform_indices = @transform_2, window_bounds = array<i64: 1, 384>}, {pipeline_mode = #tpu.pipeline_mode<synchronous>, transform_indices = @transform_3, window_bounds = array<i64: 128, 128>}, {pipeline_mode = #tpu.pipeline_mode<synchronous>, transform_indices = @transform_4, window_bounds = array<i64: 1, 128>}, {pipeline_mode = #tpu.pipeline_mode<synchronous>, transform_indices = @transform_5, window_bounds = array<i64: 128, 512>}, {pipeline_mode = #tpu.pipeline_mode<synchronous>, transform_indices = @transform_6, window_bounds = array<i64: 1, 512>}, {pipeline_mode = #tpu.pipeline_mode<synchronous>, transform_indices = @transform_7, window_bounds = array<i64: 512, 128>}, {pipeline_mode = #tpu.pipeline_mode<synchronous>, transform_indices = @transform_8, window_bounds = array<i64: 1, 128>}, {transform_indices = @transform_9, window_bounds = array<i64: 1, 8, 128>}]} {
    %c0 = arith.constant 0 : index
    %c0_0 = arith.constant 0 : index
    %c0_1 = arith.constant 0 : index
    %0 = vector.load %arg1[%c0, %c0_0, %c0_1] : memref<1x8x128xf32, #tpu.memory_space<vmem>>, vector<1x8x128xf32>
    %1 = vector.shape_cast %0 : vector<1x8x128xf32> to vector<8x128xf32>
    %c0_2 = arith.constant 0 : index
    %c0_3 = arith.constant 0 : index
    %2 = vector.load %arg2[%c0_2, %c0_3] : memref<128x384xf32, #tpu.memory_space<vmem>>, vector<128x384xf32>
    %cst = arith.constant dense<0.000000e+00> : vector<8x384xf32>
    %3 = tpu.matmul %1, %2, %cst {dimension_numbers = #tpu.dot_dimension_numbers<[1], [0], [0], [1], [0, 0, 1, 1], [], []>} : vector<8x128xf32>, vector<128x384xf32>, vector<8x384xf32> -> vector<8x384xf32>
    %c0_4 = arith.constant 0 : index
    %c0_5 = arith.constant 0 : index
    %4 = vector.load %arg3[%c0_4, %c0_5] : memref<1x384xf32, #tpu.memory_space<vmem>>, vector<1x384xf32>
    %5 = vector.broadcast %4 : vector<1x384xf32> to vector<8x384xf32>
    %6 = arith.addf %3, %5 : vector<8x384xf32>
    %7 = vector.shape_cast %6 : vector<8x384xf32> to vector<1x8x384xf32>
    %8 = vector.extract_strided_slice %7 {offsets = [0, 0, 0], sizes = [1, 8, 32], strides = [1, 1, 1]} : vector<1x8x384xf32> to vector<1x8x32xf32>
    %9 = vector.extract_strided_slice %7 {offsets = [0, 0, 32], sizes = [1, 8, 32], strides = [1, 1, 1]} : vector<1x8x384xf32> to vector<1x8x32xf32>
    %10 = vector.extract_strided_slice %7 {offsets = [0, 0, 64], sizes = [1, 8, 32], strides = [1, 1, 1]} : vector<1x8x384xf32> to vector<1x8x32xf32>
    %11 = vector.extract_strided_slice %7 {offsets = [0, 0, 96], sizes = [1, 8, 32], strides = [1, 1, 1]} : vector<1x8x384xf32> to vector<1x8x32xf32>
    %12 = vector.extract_strided_slice %7 {offsets = [0, 0, 128], sizes = [1, 8, 32], strides = [1, 1, 1]} : vector<1x8x384xf32> to vector<1x8x32xf32>
    %13 = vector.extract_strided_slice %7 {offsets = [0, 0, 160], sizes = [1, 8, 32], strides = [1, 1, 1]} : vector<1x8x384xf32> to vector<1x8x32xf32>
    %14 = vector.extract_strided_slice %7 {offsets = [0, 0, 192], sizes = [1, 8, 32], strides = [1, 1, 1]} : vector<1x8x384xf32> to vector<1x8x32xf32>
    %15 = vector.extract_strided_slice %7 {offsets = [0, 0, 224], sizes = [1, 8, 32], strides = [1, 1, 1]} : vector<1x8x384xf32> to vector<1x8x32xf32>
    %16 = vector.extract_strided_slice %7 {offsets = [0, 0, 256], sizes = [1, 8, 32], strides = [1, 1, 1]} : vector<1x8x384xf32> to vector<1x8x32xf32>
    %17 = vector.extract_strided_slice %7 {offsets = [0, 0, 288], sizes = [1, 8, 32], strides = [1, 1, 1]} : vector<1x8x384xf32> to vector<1x8x32xf32>
    %18 = vector.extract_strided_slice %7 {offsets = [0, 0, 320], sizes = [1, 8, 32], strides = [1, 1, 1]} : vector<1x8x384xf32> to vector<1x8x32xf32>
    %19 = vector.extract_strided_slice %7 {offsets = [0, 0, 352], sizes = [1, 8, 32], strides = [1, 1, 1]} : vector<1x8x384xf32> to vector<1x8x32xf32>
    %20 = tpu.concatenate %8, %9, %10, %11, %12, %13, %14, %15, %16, %17, %18, %19 in 0 : vector<1x8x32xf32>, vector<1x8x32xf32>, vector<1x8x32xf32>, vector<1x8x32xf32>, vector<1x8x32xf32>, vector<1x8x32xf32>, vector<1x8x32xf32>, vector<1x8x32xf32>, vector<1x8x32xf32>, vector<1x8x32xf32>, vector<1x8x32xf32>, vector<1x8x32xf32> -> vector<12x8x32xf32>
    %21 = vector.extract_strided_slice %20 {offsets = [0, 0, 0], sizes = [4, 8, 32], strides = [1, 1, 1]} : vector<12x8x32xf32> to vector<4x8x32xf32>
    %22 = vector.extract_strided_slice %20 {offsets = [4, 0, 0], sizes = [4, 8, 32], strides = [1, 1, 1]} : vector<12x8x32xf32> to vector<4x8x32xf32>
    %23 = vector.extract_strided_slice %20 {offsets = [8, 0, 0], sizes = [4, 8, 32], strides = [1, 1, 1]} : vector<12x8x32xf32> to vector<4x8x32xf32>
    "tpu.trace_start"() <{level = 10 : i32, message = "nqd,nkd->nqk"}> : () -> ()
    %cst_6 = arith.constant dense<0.000000e+00> : vector<4x8x8xf32>
    %24 = tpu.matmul %21, %22, %cst_6 {dimension_numbers = #tpu.dot_dimension_numbers<[2], [2], [1], [1], [0, 0, 0, 1, 1, 1], [0], [0]>} : vector<4x8x32xf32>, vector<4x8x32xf32>, vector<4x8x8xf32> -> vector<4x8x8xf32>
    "tpu.trace_stop"() : () -> ()
    %cst_7 = arith.constant dense<0xFF800000> : vector<4x8xf32>
    %25 = vector.multi_reduction <maximumf>, %24, %cst_7 [2] : vector<4x8x8xf32> to vector<4x8xf32>
    %26 = vector.shape_cast %25 : vector<4x8xf32> to vector<4x8x1xf32>
    %27 = vector.broadcast %26 : vector<4x8x1xf32> to vector<4x8x8xf32>
    %28 = arith.subf %24, %27 : vector<4x8x8xf32>
    %29 = math.exp %28 : vector<4x8x8xf32>
    %cst_8 = arith.constant dense<0.000000e+00> : vector<4x8xf32>
    %30 = vector.multi_reduction <add>, %29, %cst_8 [2] : vector<4x8x8xf32> to vector<4x8xf32>
    %31 = vector.shape_cast %30 : vector<4x8xf32> to vector<4x8x1xf32>
    "tpu.trace_start"() <{level = 10 : i32, message = "nqk,nkd->nqd"}> : () -> ()
    %cst_9 = arith.constant dense<0.000000e+00> : vector<4x8x32xf32>
    %32 = tpu.matmul %29, %23, %cst_9 {dimension_numbers = #tpu.dot_dimension_numbers<[2], [1], [1], [2], [0, 0, 0, 1, 1, 2], [0], [0]>} : vector<4x8x8xf32>, vector<4x8x32xf32>, vector<4x8x32xf32> -> vector<4x8x32xf32>
    "tpu.trace_stop"() : () -> ()
    %33 = tpu.reciprocal %31 {approx = true} : vector<4x8x1xf32> -> vector<4x8x1xf32>
    %34 = vector.broadcast %33 : vector<4x8x1xf32> to vector<4x8x32xf32>
    %35 = arith.mulf %32, %34 : vector<4x8x32xf32>
    %36 = vector.extract_strided_slice %35 {offsets = [0, 0, 0], sizes = [1, 8, 32], strides = [1, 1, 1]} : vector<4x8x32xf32> to vector<1x8x32xf32>
    %37 = vector.extract_strided_slice %35 {offsets = [1, 0, 0], sizes = [1, 8, 32], strides = [1, 1, 1]} : vector<4x8x32xf32> to vector<1x8x32xf32>
    %38 = vector.extract_strided_slice %35 {offsets = [2, 0, 0], sizes = [1, 8, 32], strides = [1, 1, 1]} : vector<4x8x32xf32> to vector<1x8x32xf32>
    %39 = vector.extract_strided_slice %35 {offsets = [3, 0, 0], sizes = [1, 8, 32], strides = [1, 1, 1]} : vector<4x8x32xf32> to vector<1x8x32xf32>
    %40 = tpu.concatenate %36, %37, %38, %39 in 2 : vector<1x8x32xf32>, vector<1x8x32xf32>, vector<1x8x32xf32>, vector<1x8x32xf32> -> vector<1x8x128xf32>
    %41 = vector.shape_cast %40 : vector<1x8x128xf32> to vector<8x128xf32>
    %c0_10 = arith.constant 0 : index
    %c0_11 = arith.constant 0 : index
    %42 = vector.load %arg4[%c0_10, %c0_11] : memref<128x128xf32, #tpu.memory_space<vmem>>, vector<128x128xf32>
    %cst_12 = arith.constant dense<0.000000e+00> : vector<8x128xf32>
    %43 = tpu.matmul %41, %42, %cst_12 {dimension_numbers = #tpu.dot_dimension_numbers<[1], [0], [0], [1], [0, 0, 1, 1], [], []>} : vector<8x128xf32>, vector<128x128xf32>, vector<8x128xf32> -> vector<8x128xf32>
    %c0_13 = arith.constant 0 : index
    %c0_14 = arith.constant 0 : index
    %44 = vector.load %arg5[%c0_13, %c0_14] : memref<1x128xf32, #tpu.memory_space<vmem>>, vector<1x128xf32>
    %45 = vector.broadcast %44 : vector<1x128xf32> to vector<8x128xf32>
    %46 = arith.addf %43, %45 : vector<8x128xf32>
    %47 = arith.addf %46, %1 : vector<8x128xf32>
    %cst_15 = arith.constant dense<0.000000e+00> : vector<8xf32>
    %48 = vector.multi_reduction <add>, %47, %cst_15 [1] : vector<8x128xf32> to vector<8xf32>
    %49 = vector.shape_cast %48 : vector<8xf32> to vector<8x1xf32>
    %cst_16 = arith.constant 1.280000e+02 : f32
    %50 = vector.broadcast %cst_16 : f32 to vector<8x1xf32>
    %51 = arith.divf %49, %50 : vector<8x1xf32>
    %52 = vector.broadcast %51 : vector<8x1xf32> to vector<8x128xf32>
    %53 = arith.subf %47, %52 : vector<8x128xf32>
    %54 = arith.mulf %53, %53 : vector<8x128xf32>
    %cst_17 = arith.constant dense<0.000000e+00> : vector<8xf32>
    %55 = vector.multi_reduction <add>, %54, %cst_17 [1] : vector<8x128xf32> to vector<8xf32>
    %56 = vector.shape_cast %55 : vector<8xf32> to vector<8x1xf32>
    %cst_18 = arith.constant 1.280000e+02 : f32
    %57 = vector.broadcast %cst_18 : f32 to vector<8x1xf32>
    %58 = arith.divf %56, %57 : vector<8x1xf32>
    %59 = vector.broadcast %51 : vector<8x1xf32> to vector<8x128xf32>
    %60 = arith.subf %47, %59 : vector<8x128xf32>
    %cst_19 = arith.constant 9.99999974E-6 : f32
    %61 = vector.broadcast %cst_19 : f32 to vector<8x1xf32>
    %62 = arith.addf %58, %61 : vector<8x1xf32>
    %63 = math.rsqrt %62 : vector<8x1xf32>
    %64 = vector.broadcast %63 : vector<8x1xf32> to vector<8x128xf32>
    %65 = arith.mulf %60, %64 : vector<8x128xf32>
    %c0_20 = arith.constant 0 : index
    %c0_21 = arith.constant 0 : index
    %66 = vector.load %arg6[%c0_20, %c0_21] : memref<128x512xf32, #tpu.memory_space<vmem>>, vector<128x512xf32>
    %cst_22 = arith.constant dense<0.000000e+00> : vector<8x512xf32>
    %67 = tpu.matmul %65, %66, %cst_22 {dimension_numbers = #tpu.dot_dimension_numbers<[1], [0], [0], [1], [0, 0, 1, 1], [], []>} : vector<8x128xf32>, vector<128x512xf32>, vector<8x512xf32> -> vector<8x512xf32>
    %c0_23 = arith.constant 0 : index
    %c0_24 = arith.constant 0 : index
    %68 = vector.load %arg7[%c0_23, %c0_24] : memref<1x512xf32, #tpu.memory_space<vmem>>, vector<1x512xf32>
    %69 = vector.broadcast %68 : vector<1x512xf32> to vector<8x512xf32>
    %70 = arith.addf %67, %69 : vector<8x512xf32>
    %cst_25 = arith.constant 0.000000e+00 : f32
    %71 = vector.broadcast %cst_25 : f32 to vector<8x512xf32>
    %72 = arith.maximumf %70, %71 : vector<8x512xf32>
    %c0_26 = arith.constant 0 : index
    %c0_27 = arith.constant 0 : index
    %73 = vector.load %arg8[%c0_26, %c0_27] : memref<512x128xf32, #tpu.memory_space<vmem>>, vector<512x128xf32>
    %cst_28 = arith.constant dense<0.000000e+00> : vector<8x128xf32>
    %74 = tpu.matmul %72, %73, %cst_28 {dimension_numbers = #tpu.dot_dimension_numbers<[1], [0], [0], [1], [0, 0, 1, 1], [], []>} : vector<8x512xf32>, vector<512x128xf32>, vector<8x128xf32> -> vector<8x128xf32>
    %c0_29 = arith.constant 0 : index
    %c0_30 = arith.constant 0 : index
    %75 = vector.load %arg9[%c0_29, %c0_30] : memref<1x128xf32, #tpu.memory_space<vmem>>, vector<1x128xf32>
    %76 = vector.broadcast %75 : vector<1x128xf32> to vector<8x128xf32>
    %77 = arith.addf %74, %76 : vector<8x128xf32>
    %78 = arith.addf %77, %65 : vector<8x128xf32>
    %cst_31 = arith.constant dense<0.000000e+00> : vector<8xf32>
    %79 = vector.multi_reduction <add>, %78, %cst_31 [1] : vector<8x128xf32> to vector<8xf32>
    %80 = vector.shape_cast %79 : vector<8xf32> to vector<8x1xf32>
    %cst_32 = arith.constant 1.280000e+02 : f32
    %81 = vector.broadcast %cst_32 : f32 to vector<8x1xf32>
    %82 = arith.divf %80, %81 : vector<8x1xf32>
    %83 = vector.broadcast %82 : vector<8x1xf32> to vector<8x128xf32>
    %84 = arith.subf %78, %83 : vector<8x128xf32>
    %85 = arith.mulf %84, %84 : vector<8x128xf32>
    %cst_33 = arith.constant dense<0.000000e+00> : vector<8xf32>
    %86 = vector.multi_reduction <add>, %85, %cst_33 [1] : vector<8x128xf32> to vector<8xf32>
    %87 = vector.shape_cast %86 : vector<8xf32> to vector<8x1xf32>
    %cst_34 = arith.constant 1.280000e+02 : f32
    %88 = vector.broadcast %cst_34 : f32 to vector<8x1xf32>
    %89 = arith.divf %87, %88 : vector<8x1xf32>
    %90 = vector.broadcast %82 : vector<8x1xf32> to vector<8x128xf32>
    %91 = arith.subf %78, %90 : vector<8x128xf32>
    %cst_35 = arith.constant 9.99999974E-6 : f32
    %92 = vector.broadcast %cst_35 : f32 to vector<8x1xf32>
    %93 = arith.addf %89, %92 : vector<8x1xf32>
    %94 = math.rsqrt %93 : vector<8x1xf32>
    %95 = vector.broadcast %94 : vector<8x1xf32> to vector<8x128xf32>
    %96 = arith.mulf %91, %95 : vector<8x128xf32>
    %97 = vector.shape_cast %96 : vector<8x128xf32> to vector<1x8x128xf32>
    %c0_36 = arith.constant 0 : index
    %c0_37 = arith.constant 0 : index
    %c0_38 = arith.constant 0 : index
    %98 = vector.load %arg10[%c0_36, %c0_37, %c0_38] : memref<1x8x128xf32, #tpu.memory_space<vmem>>, vector<1x8x128xf32>
    tpu.vector_store %arg10[%c0_36, %c0_37, %c0_38], %97 {strides = array<i32>} : memref<1x8x128xf32, #tpu.memory_space<vmem>>, vector<1x8x128xf32>,
    return
  }
  func.func @transform_0(%arg0: i32) -> (i32, i32, i32) {
    %c0_i32 = arith.constant 0 : i32
    %c0_i32_0 = arith.constant 0 : i32
    %c0_i32_1 = arith.constant 0 : i32
    return %arg0, %c0_i32, %c0_i32_0 : i32, i32, i32
  }
  func.func @transform_1(%arg0: i32) -> (i32, i32) {
    %c0_i32 = arith.constant 0 : i32
    %c0_i32_0 = arith.constant 0 : i32
    %c0_i32_1 = arith.constant 0 : i32
    return %c0_i32, %c0_i32_0 : i32, i32
  }
  func.func @transform_2(%arg0: i32) -> (i32, i32) {
    %c0_i32 = arith.constant 0 : i32
    %c0_i32_0 = arith.constant 0 : i32
    %c0_i32_1 = arith.constant 0 : i32
    return %c0_i32, %c0_i32_0 : i32, i32
  }
  func.func @transform_3(%arg0: i32) -> (i32, i32) {
    %c0_i32 = arith.constant 0 : i32
    %c0_i32_0 = arith.constant 0 : i32
    %c0_i32_1 = arith.constant 0 : i32
    return %c0_i32, %c0_i32_0 : i32, i32
  }
  func.func @transform_4(%arg0: i32) -> (i32, i32) {
    %c0_i32 = arith.constant 0 : i32
    %c0_i32_0 = arith.constant 0 : i32
    %c0_i32_1 = arith.constant 0 : i32
    return %c0_i32, %c0_i32_0 : i32, i32
  }
  func.func @transform_5(%arg0: i32) -> (i32, i32) {
    %c0_i32 = arith.constant 0 : i32
    %c0_i32_0 = arith.constant 0 : i32
    %c0_i32_1 = arith.constant 0 : i32
    return %c0_i32, %c0_i32_0 : i32, i32
  }
  func.func @transform_6(%arg0: i32) -> (i32, i32) {
    %c0_i32 = arith.constant 0 : i32
    %c0_i32_0 = arith.constant 0 : i32
    %c0_i32_1 = arith.constant 0 : i32
    return %c0_i32, %c0_i32_0 : i32, i32
  }
  func.func @transform_7(%arg0: i32) -> (i32, i32) {
    %c0_i32 = arith.constant 0 : i32
    %c0_i32_0 = arith.constant 0 : i32
    %c0_i32_1 = arith.constant 0 : i32
    return %c0_i32, %c0_i32_0 : i32, i32
  }
  func.func @transform_8(%arg0: i32) -> (i32, i32) {
    %c0_i32 = arith.constant 0 : i32
    %c0_i32_0 = arith.constant 0 : i32
    %c0_i32_1 = arith.constant 0 : i32
    return %c0_i32, %c0_i32_0 : i32, i32
  }
  func.func @transform_9(%arg0: i32) -> (i32, i32, i32) {
    %c0_i32 = arith.constant 0 : i32
    %c0_i32_0 = arith.constant 0 : i32
    %c0_i32_1 = arith.constant 0 : i32
    return %arg0, %c0_i32, %c0_i32_0 : i32, i32, i32
  }
}

</mosaic_0001>

<bundles_post_ra>
// kernel: tpu_custom_call.1
= control target key start
LH: loop header
LB: loop body
LE: loop exit
PB: predicated region body
PF: predicated region fallthrough
CT: control target
= control target key end

     0   :  { %s2091_s0 = inlined_call_operand.hbm [shape: f32[2,8,128], index: 0, kind: input, shape index: {}]   ;;  %s2092_s1 = inlined_call_operand.hbm [shape: f32[128,384], index: 1, kind: input, shape index: {}]   ;;  %s2093_s2 = inlined_call_operand.hbm [shape: f32[1,384], index: 2, kind: input, shape index: {}]   ;;  %s2094_s3 = inlined_call_operand.hbm [shape: f32[128,128], index: 3, kind: input, shape index: {}]   ;;  %s2095_s4 = inlined_call_operand.vmem [shape: f32[1,128], index: 4, kind: input, shape index: {}]   ;;  %s2096_s5 = inlined_call_operand.hbm [shape: f32[128,512], index: 5, kind: input, shape index: {}]   ;;  %s2097_s6 = inlined_call_operand.vmem [shape: f32[1,512], index: 6, kind: input, shape index: {}]   ;;  %s2098_s7 = inlined_call_operand.hbm [shape: f32[512,128], index: 7, kind: input, shape index: {}]   ;;  %s2099_s8 = inlined_call_operand.vmem [shape: f32[1,128], index: 8, kind: input, shape index: {}]   ;;  %s2100_s9 = inlined_call_operand.hbm [shape: f32[2,8,128], index: 9, kind: output, shape index: {}]  }
   0x1   :  { %2101 = sst [smem:[#allocation19_spill]] %s2092_s1 }
   0x2   :  { %2102 = sst [smem:[#allocation20_spill]] %s2093_s2 }
   0x3   :  { %2103 = sst [smem:[#allocation21_spill]] %s2094_s3 }
   0x4   :  { %14 = vsyncpa [#allocation3], 0 }
   0x5   :  { %16 = vsyncpa [#allocation3 + $0x1], 0 }
   0x6   :  { %17 = vsyncpa [#allocation6], 0 }
   0x7   :  { %18 = vsyncpa [#allocation9], 0 }
   0x8   :  { %19 = vsyncpa [#allocation12], 0 }
   0x9   :  { %20 = vsyncpa [#allocation4], 0 }
   0xa   :  { %22 = vsyncpa [#allocation4 + $0x1], 0  ;;  %s1843_s30 = smov 0   ;;  %s1845_s10 = smov 0  }
   0xb   :  { %s1847_s11 = smov 0   ;;  %s1849_s12 = smov 0  }
   0xc LB: > { %s2104_s1 = sld [smem:[#allocation19_spill]]  ;;  %s1867_s16 = sadd.s32 4294967295, %s1776_s12   ;;  %s1776_s12 = sphi %s1849_s12, %s2117_s12   ;;  %s1772_s11 = sphi %s1847_s11, %s2116_s11   ;;  %s1768_s10 = sphi %s1845_s10, %s2115_s10   ;;  %s1764_s30 = sphi %s1843_s30, %s2114_s30  }
   0xd   : > { %p1354_p0 = scmp.ge.s32.totalorder %s1776_s12, 1  ;;  %p49_p1 = scmp.eq.s32.totalorder %s1867_s16, 0 }
   0xe   : > { %p253_p2 = scmp.lt.s32.totalorder %s1776_s12, 3  ;;  %s1778_s18 = smov [#allocation5]  }
   0xf   : > { %s266_s19 = sshll.u32 %s1778_s18, 4  ;;  %s2106_s3 = sld [smem:[#allocation21_spill]]  ;;  %s267_s19 = int_to_ptr.vmem [resolvable:$true] %s266_s19 }
  0x10   : > { %p1872_p3 = pnand %p1354_p0, %p253_p2  ;;  %s1779_s24 = smov [#allocation8]  }
  0x11   : > { %s292_s25 = sshll.u32 %s1779_s24, 4  ;;  %s1780_s26 = smov 384   ;;  %s293_s25 = int_to_ptr.vmem [resolvable:$true] %s292_s25 }
  0x12   : > { %s264_s15 = sshll.u32 %s2104_s1, 4  ;;  %p1411_p4 = pneg %p1872_p3  ;;  %s265_s15 = int_to_ptr.hbm [resolvable:$true] %s264_s15 }
  0x13   : > { %s1781_s27 = smov 24   ;;  %s1782_s28 = smov 128  }
  0x14   : > { %p1884_p6 = pnand %p1411_p4, %p49_p1  ;;  %s1783_s29 = smov 8  }
  0x15   : > { %s290_s22 = sshll.u32 %s2106_s3, 4  ;;  %s2108_s2 = sld [smem:[#allocation20_spill]]  ;;  %s291_s22 = int_to_ptr.hbm [resolvable:$true] %s290_s22 }
  0x16   : > { %1414 = dma.hbm_to_vmem [thread:$0]  (!%p1884_p6), %s265_s15, 6144, %s267_s19, [#allocation6], %s1780_s26, %s1780_s26, %s1781_s27  }
  0x17   : > { %1420 = dma.hbm_to_vmem [thread:$0]  (!%p1884_p6), %s291_s22, 2048, %s293_s25, [#allocation9], %s1782_s28, %s1782_s28, %s1783_s29  }
  0x18   : > { %s1784_s20 = smov [#allocation7]   ;;  %s307_s15 = sshll.u32 %s2096_s5, 4  ;;  %s308_s15 = int_to_ptr.hbm [resolvable:$true] %s307_s15 }
  0x19   : > { %s281_s21 = sshll.u32 %s1784_s20, 4  ;;  %s1785_s19 = smov [#allocation10]   ;;  %s282_s21 = int_to_ptr.vmem [resolvable:$true] %s281_s21 }
  0x1a   : > { %s309_s22 = sshll.u32 %s1785_s19, 4  ;;  %s1786_s25 = smov 512   ;;  %s310_s22 = int_to_ptr.vmem [resolvable:$true] %s309_s22 }
  0x1b   : > { %s279_s18 = sshll.u32 %s2108_s2, 4  ;;  %s1787_s26 = smov 32   ;;  %s280_s18 = int_to_ptr.hbm [resolvable:$true] %s279_s18 }
  0x1c   : > { %1417 = dma.hbm_to_vmem [thread:$0]  (!%p1884_p6), %s280_s18, 48, %s282_s21, [#allocation6]  }
  0x1d   : > { %1423 = dma.hbm_to_vmem [thread:$0]  (!%p1884_p6), %s308_s15, 8192, %s310_s22, [#allocation9], %s1786_s25, %s1786_s25, %s1787_s26  }
  0x1e   : > { %s324_s13 = sshll.u32 %s2098_s7, 4  ;;  %s1788_s14 = smov [#allocation11]   ;;  %s325_s13 = int_to_ptr.hbm [resolvable:$true] %s324_s13 }
  0x1f   : > { %s326_s18 = sshll.u32 %s1788_s14, 4  ;;  %s1353_s20 = sadd.s32 4294967294, %s1776_s12   ;;  %s327_s18 = int_to_ptr.vmem [resolvable:$true] %s326_s18 }
  0x20   : > { %1426 = dma.hbm_to_vmem [thread:$0]  (!%p1884_p6), %s325_s13, 8192, %s327_s18, [#allocation12], %s1782_s28, %s1782_s28, %s1783_s29  }
  0x21   : > { %s1909_s21 = sadd.s32 1, %s1776_s12   ;;  %s35_s24 = sadd.s32 1, %s1772_s11 }
  0x22   : > { %s32_s15 = ssub.s32 %s1776_s12, %s1909_s21  ;;  %p42_p7 = scmp.ne.s32.totalorder %s1772_s11, %s1768_s10 }
  0x23   : > { %p33_p8 = scmp.eq.s32.totalorder %s32_s15, 0  ;;  %p43_p9 = scmp.eq.s32.totalorder %s1776_s12, 0 }
  0x24   : > { %p48_p10 = scmp.ne.s32.totalorder %s1768_s10, %s1764_s30  ;;  %p240_p11 = scmp.eq.s32.totalorder %s1867_s16, 1 }
  0x25   : > { %s1921_s19 = scalar_select %p33_p8, %s1772_s11, %s35_s24  }
  0x26   : > { %p1925_p12 = por %p49_p1, %p48_p10  ;;  %p1929_p13 = por %p240_p11, %p42_p7 }
  0x27   : > { %p246_p0 = scmp.eq.s32.totalorder %s1353_s20, 1  ;;  %p44_p2 = por %p43_p9, %p42_p7 }
  0x28   : > { %s343_s29 = sand.u32 1, %s1772_s11   ;;  %p1440_p6 = scmp.lt.s32.totalorder %s1776_s12, 2 }
  0x29   : > { %p1934_p4 = por %p246_p0, %p48_p10  ;;  %s1361_s25 = sshll.u32 %s343_s29, 3 }
  0x2a   : > { %s1362_s26 = sshll.u32 %s1776_s12, 3  ;;  %s347_s18 = scalar_lea.vmem [#allocation2], %s1361_s25 }
  0x2b   : > { %s351_s13 = scalar_lea.hbm %s2091_s0, %s1362_s26  ;;  %s355_s24 = sshll.u32 %s347_s18, 4  ;;  %s356_s24 = int_to_ptr.vmem [resolvable:$true] %s355_s24 }
  0x2c   : > { %s353_s14 = sshll.u32 %s351_s13, 4  ;;  %p1943_p8 = pnand %p1440_p6, %p44_p2  ;;  %s354_s14 = int_to_ptr.hbm [resolvable:$true] %s353_s14 }
  0x2d   : > { %s344_s15 = scalar_lea.sflag [#allocation3], %s343_s29  ;;  %s1668_s2 = sshra.s32 %s354_s14, 4  ;;  %s1669_s2 = int_to_ptr.hbm [resolvable:$true] %s1668_s2 }
  0x2e   : > { %s1670_s3 = scalar_lea.hbm %s1669_s2, 8  ;;  %p1672_p9 = pneg %p1943_p8 }
  0x2f   : > { %p1671_p7 = scmp.ne.s32.totalorder %s1669_s2, %s1670_s3  ;;  %s1675_s25 = scalar_lea.hbm %s2091_s0, 16 }
  0x30   : > { %p1676_p0 = scmp.lt.s32.totalorder %s1669_s2, %s2091_s0  ;;  %p1677_p2 = scmp.lt.s32.totalorder %s1675_s25, %s1670_s3 }
  0x31   : > { %p1673_p10 = pnand %p1672_p9, %p1671_p7 }
  0x32   : > { %p1678_p6 = por %p1677_p2, %p1676_p0 }
  0x33   : > { %p1674_p11 = pneg %p1673_p10 }
  0x35   : > { %p1679_p5 = pnand %p1678_p6, %p1674_p11 }
  0x37   : > { %1682 = shalt.err (!%p1679_p5)
}
  0x38   : > { %1430 = dma.hbm_to_vmem [thread:$0]  (!%p1943_p8), %s354_s14, 128, %s356_s24, %s344_s15  }
  0x39   : > { %364 = sbr.rel (%p1872_p3) target bundleno = 1806 (0x70e), region = 56  ;;  %s1960_s29 = sand.u32 (!%p1872_p3), 1, %s1768_s10  }
  0x3a   : > { %s1364_s18 = sshll.u32 (!%p1872_p3), %s1960_s29, 3  ;;  %s367_s26 = scalar_lea.sflag (!%p1872_p3), [#allocation3], %s1960_s29 }
  0x3b   : > { %s1966_s2 = scalar_lea.vmem (!%p1872_p3), [#allocation2], %s1364_s18 }
  0x3e   : > { %1743 = dma.done.wait (%p1925_p12), %s367_s26, 128  }
  0x3f   : > { %1745 = vsyncadd (%p1925_p12), %s367_s26, 4294967168 }
  0x40   : > { %1747 = dma.done.wait (%p49_p1), [#allocation6], 6192  }
  0x41   : > { %1749 = vsyncadd (%p49_p1), [#allocation6], 4294961104 }
  0x42   : > { %1751 = dma.done.wait (%p49_p1), [#allocation9], 10240  }
  0x43   : > { %1753 = vsyncadd (%p49_p1), [#allocation9], 4294957056 }
  0x44   : > { %1755 = dma.done.wait (%p49_p1), [#allocation12], 8192  }
  0x45   : > { %1757 = vsyncadd (%p49_p1), [#allocation12], 4294959104  ;;  %v478_v0 = vld [vmem:[#allocation5 + $0x170] sm:$0xff]  ;;  %v475_v1 = vld [vmem:[#allocation5 + $0x158] sm:$0xff]  ;;  %vm572_vm0 = vcmask 261120   ;;  %s1789_s3 = smov 96  }
  0x46   : > { %508 = vmatpush.msra.mxu1 %v478_v0  ;;  %v477_v2 = vld [vmem:[#allocation5 + $0x168] sm:$0xff]  ;;  %v472_v3 = vld [vmem:[#allocation5 + $0x140] sm:$0xff]  ;;  %v474_v4 = vld [vmem:[#allocation5 + $0x150] sm:$0xff]  ;;  %s1790_s17 = smov 64   ;;  %s1791_s23 = smov 32   ;;  %vm669_vm1 = vcmask 64512  }
  0x47   : > { %488 = vmatpush.msra.mxu0 %v477_v2  ;;  %v471_v5 = vld [vmem:[#allocation5 + $0x138] sm:$0xff]  ;;  %v469_v6 = vld [vmem:[#allocation5 + $0x128] sm:$0xff]  ;;  %v468_v7 = vld [vmem:[#allocation5 + $0x120] sm:$0xff]  ;;  %vm819_vm2 = vcmask 523264   ;;  %vm821_vm3 = vcmask 785408   ;;  %s1384_s27 = sshll.u32 %s1867_s16, 3 }
  0x48   : > { %509 = vmatpush.msra.mxu1 %v475_v1  ;;  %v466_v8 = vld [vmem:[#allocation5 + $0x110] sm:$0xff]  ;;  %v465_v9 = vld [vmem:[#allocation5 + $0x108] sm:$0xff]  ;;  %v463_v10 = vld [vmem:[#allocation5 + $0xf8] sm:$0xff]  ;;  %s1220_s16 = scalar_lea.sflag [#allocation4], %s1960_s29 }
  0x49   : > { %489 = vmatpush.msra.mxu0 %v474_v4  ;;  %v462_v11 = vld [vmem:[#allocation5 + $0xf0] sm:$0xff]  ;;  %v460_v12 = vld [vmem:[#allocation5 + $0xe0] sm:$0xff]  ;;  %v459_v13 = vld [vmem:[#allocation5 + $0xd8] sm:$0xff] }
  0x4a   : > { %510 = vmatpush.msra.mxu1 %v472_v3  ;;  %v457_v14 = vld [vmem:[#allocation5 + $0xc8] sm:$0xff]  ;;  %v456_v15 = vld [vmem:[#allocation5 + $0xc0] sm:$0xff]  ;;  %v454_v16 = vld [vmem:[#allocation5 + $0xb0] sm:$0xff] }
  0x4b   : > { %490 = vmatpush.msra.mxu0 %v471_v5  ;;  %v453_v17 = vld [vmem:[#allocation5 + $0xa8] sm:$0xff]  ;;  %v451_v18 = vld [vmem:[#allocation5 + $0x98] sm:$0xff]  ;;  %v450_v19 = vld [vmem:[#allocation5 + $0x90] sm:$0xff] }
  0x4c   : > { %511 = vmatpush.msra.mxu1 %v469_v6  ;;  %v448_v20 = vld [vmem:[#allocation5 + $0x80] sm:$0xff]  ;;  %v447_v21 = vld [vmem:[#allocation5 + $0x78] sm:$0xff]  ;;  %v445_v22 = vld [vmem:[#allocation5 + $0x68] sm:$0xff] }
  0x4d   : > { %491 = vmatpush.msra.mxu0 %v468_v7  ;;  %v444_v23 = vld [vmem:[#allocation5 + $0x60] sm:$0xff]  ;;  %v442_v24 = vld [vmem:[#allocation5 + $0x50] sm:$0xff]  ;;  %v441_v25 = vld [vmem:[#allocation5 + $0x48] sm:$0xff] }
  0x4e   : > { %512 = vmatpush.msra.mxu1 %v466_v8  ;;  %v439_v26 = vld [vmem:[#allocation5 + $0x38] sm:$0xff]  ;;  %v438_v27 = vld [vmem:[#allocation5 + $0x30] sm:$0xff]  ;;  %v436_v28 = vld [vmem:[#allocation5 + $0x20] sm:$0xff] }
  0x4f   : > { %492 = vmatpush.msra.mxu0 %v465_v9  ;;  %v435_v29 = vld [vmem:[#allocation5 + $0x18] sm:$0xff]  ;;  %v433_v30 = vld [vmem:[#allocation5 + $0x8] sm:$0xff]  ;;  %v432_v32 = vld [vmem:[#allocation5] sm:$0xff] }
  0x50   : > { %513 = vmatpush.msra.mxu1 %v463_v10  ;;  %v1985_v31 = vld [vmem:[%s1966_s2] sm:$0xff]  ;;  %v476_v34 = vld [vmem:[#allocation5 + $0x160] sm:$0xff]  ;;  %v473_v35 = vld [vmem:[#allocation5 + $0x148] sm:$0xff]  ;;  %s1230_s2 = scalar_lea.hbm %s2100_s9, %s1384_s27 }
  0x51   : > { %493 = vmatpush.msra.mxu0 %v462_v11  ;;  %v479_v33 = vld [vmem:[#allocation5 + $0x178] sm:$0xff]  ;;  %v470_v36 = vld [vmem:[#allocation5 + $0x130] sm:$0xff]  ;;  %v480_v37 = vld [vmem:[#allocation7] sm:$0x7] }
  0x52   : > { %514 = vmatpush.msra.mxu1 %v460_v12  ;;  %528 = vmatpush.msra.mxu2 %v479_v33  ;;  %v483_v38 = vperm.slane %v480_v37, 1  ;;  %v482_v39 = vperm.slane %v480_v37, 0  ;;  %v467_v44 = vld [vmem:[#allocation5 + $0x118] sm:$0xff]  ;;  %v464_v45 = vld [vmem:[#allocation5 + $0x100] sm:$0xff]  ;;  %v461_v46 = vld [vmem:[#allocation5 + $0xe8] sm:$0xff]  ;;  %v484_v62 = vperm.slane %v480_v37, 2 }
  0x53   : > { %494 = vmatpush.msra.mxu0 %v459_v13  ;;  %v458_v47 = vld [vmem:[#allocation5 + $0xd0] sm:$0xff]  ;;  %v455_v48 = vld [vmem:[#allocation5 + $0xb8] sm:$0xff]  ;;  %v452_v49 = vld [vmem:[#allocation5 + $0xa0] sm:$0xff] }
  0x54   : > { %515 = vmatpush.msra.mxu1 %v457_v14  ;;  %529 = vmatpush.msra.mxu2 %v476_v34  ;;  %v449_v50 = vld [vmem:[#allocation5 + $0x88] sm:$0xff]  ;;  %v446_v51 = vld [vmem:[#allocation5 + $0x70] sm:$0xff]  ;;  %v443_v52 = vld [vmem:[#allocation5 + $0x58] sm:$0xff] }
  0x55   : > { %495 = vmatpush.msra.mxu0 %v456_v15  ;;  %v440_v53 = vld [vmem:[#allocation5 + $0x40] sm:$0xff]  ;;  %v437_v54 = vld [vmem:[#allocation5 + $0x28] sm:$0xff]  ;;  %v434_v55 = vld [vmem:[#allocation5 + $0x10] sm:$0xff] }
  0x56   : > { %516 = vmatpush.msra.mxu1 %v454_v16  ;;  %530 = vmatpush.msra.mxu2 %v473_v35 }
  0x57   : > { %496 = vmatpush.msra.mxu0 %v453_v17 }
  0x58   : > { %517 = vmatpush.msra.mxu1 %v451_v18  ;;  %531 = vmatpush.msra.mxu2 %v470_v36 }
  0x59   : > { %497 = vmatpush.msra.mxu0 %v450_v19 }
  0x5a   : > { %518 = vmatpush.msra.mxu1 %v448_v20  ;;  %532 = vmatpush.msra.mxu2 %v467_v44 }
  0x5b   : > { %498 = vmatpush.msra.mxu0 %v447_v21 }
  0x5c   : > { %519 = vmatpush.msra.mxu1 %v445_v22  ;;  %533 = vmatpush.msra.mxu2 %v464_v45  ;;  %v838_v45 = vld [vmem:[#allocation8 + $0x78] sm:$0xff] }
  0x5d   : > { %499 = vmatpush.msra.mxu0 %v444_v23 }
  0x5e   : > { %520 = vmatpush.msra.mxu1 %v442_v24  ;;  %534 = vmatpush.msra.mxu2 %v461_v46  ;;  %v837_v46 = vld [vmem:[#allocation8 + $0x70] sm:$0xff] }
  0x5f   : > { %500 = vmatpush.msra.mxu0 %v441_v25 }
  0x60   : > { %521 = vmatpush.msra.mxu1 %v439_v26  ;;  %535 = vmatpush.msra.mxu2 %v458_v47  ;;  %v836_v47 = vld [vmem:[#allocation8 + $0x68] sm:$0xff] }
  0x61   : > { %501 = vmatpush.msra.mxu0 %v438_v27 }
  0x62   : > { %522 = vmatpush.msra.mxu1 %v436_v28  ;;  %536 = vmatpush.msra.mxu2 %v455_v48  ;;  %v835_v48 = vld [vmem:[#allocation8 + $0x60] sm:$0xff] }
  0x63   : > { %502 = vmatpush.msra.mxu0 %v435_v29 }
  0x64   : > { %523 = vmatpush.msra.mxu1 %v433_v30  ;;  %537 = vmatpush.msra.mxu2 %v452_v49  ;;  %v834_v49 = vld [vmem:[#allocation8 + $0x58] sm:$0xff] }
  0x65   : > { %524 = vmatmul.f32.vlgmr.msra.gmra.mxu1 %v1985_v31  ;;  %503 = vmatpush.msra.mxu0 %v432_v32 }
  0x66   : > { %504 = vmatmul.f32.vlgmr.msra.gmra.mxu0 %v1985_v31  ;;  %538 = vmatpush.msra.mxu2 %v449_v50  ;;  %v833_v50 = vld [vmem:[#allocation8 + $0x50] sm:$0xff] }
  0x68   : > { %539 = vmatpush.msra.mxu2 %v446_v51  ;;  %v832_v51 = vld [vmem:[#allocation8 + $0x48] sm:$0xff] }
  0x6a   : > { %540 = vmatpush.msra.mxu2 %v443_v52  ;;  %v831_v52 = vld [vmem:[#allocation8 + $0x40] sm:$0xff] }
  0x6c   : > { %541 = vmatpush.msra.mxu2 %v440_v53  ;;  %v830_v53 = vld [vmem:[#allocation8 + $0x38] sm:$0xff] }
  0x6e   : > { %542 = vmatpush.msra.mxu2 %v437_v54  ;;  %v829_v54 = vld [vmem:[#allocation8 + $0x30] sm:$0xff] }
  0x70   : > { %543 = vmatpush.msra.mxu2 %v434_v55  ;;  %v828_v55 = vld [vmem:[#allocation8 + $0x28] sm:$0xff] }
  0x71   : > { %544 = vmatmul.f32.vlgmr.msra.gmra.mxu2 %v1985_v31 }
  0xe2   : > { %v525_v40 = vpop.f32.mrf.mxu1 }
  0xe3   : > { %v526_v41 = vadd.f32 %v525_v40, %v483_v38  ;;  %v505_v42 = vpop.f32.mrf.mxu0 }
  0xe4   : > { %v506_v43 = vadd.f32 %v505_v42, %v482_v39 }
  0xe5   : > { %556 = vrot.lane.b32.xlu2 %v526_v41, %s1789_s3  ;;  %558 = vrot.lane.b32.xlu1 %v526_v41, %s1790_s17 }
  0xe6   : > { %560 = vrot.lane.b32.xlu0 %v526_v41, %s1791_s23  ;;  %1371 = vmatpush.xpose.msk.msrb.mxu0 %vm572_vm0, %v526_v41 }
  0xe9   : > { %1372 = vmatmul.msk.f32.vlgmr.msrb.gmra.mxu0 %vm572_vm0, %v506_v43 }
  0xed   : > { %549 = vrot.lane.b32.xlu2 %v506_v43, %s1789_s3  ;;  %551 = vrot.lane.b32.xlu1 %v506_v43, %s1790_s17 }
  0xee   : > { %553 = vrot.lane.b32.xlu0 %v506_v43, %s1791_s23 }
  0xf4   : > { %v545_v63 = vpop.f32.mrf.mxu2 }
  0xf5   : > { %v546_v0 = vadd.f32 %v545_v63, %v484_v62 }
 0x13f   : > { %v557_v56 = vpop.permute.xlu2 %556 }
 0x140   : > { %1373 = vmatpush.xpose.msk.msrb.mxu1 %vm572_vm0, %v557_v56  ;;  %v827_v56 = vld [vmem:[#allocation8 + $0x20] sm:$0xff] }
 0x147   : > { %v550_v57 = vpop.permute.xlu2 %549 }
 0x148   : > { %1374 = vmatmul.msk.f32.vlgmr.msrb.gmra.mxu1 %vm572_vm0, %v550_v57  ;;  %v826_v57 = vld [vmem:[#allocation8 + $0x18] sm:$0xff] }
 0x157   : > { %v559_v58 = vpop.permute.xlu1 %558 }
 0x158   : > { %v561_v59 = vpop.permute.xlu0 %560  ;;  %1375 = vmatpush.xpose.msk.msrb.mxu2 %vm572_vm0, %v559_v58  ;;  %v825_v58 = vld [vmem:[#allocation8 + $0x10] sm:$0xff] }
 0x159   : > { %1377 = vmatpush.xpose.msk.msra.mxu3 %vm572_vm0, %v561_v59  ;;  %v824_v59 = vld [vmem:[#allocation8 + $0x8] sm:$0xff] }
 0x15d   : > { %724 = vmatpush.msrb.mxu3 %v546_v0 }
 0x15f   : > { %v552_v60 = vpop.permute.xlu1 %551 }
 0x160   : > { %v554_v61 = vpop.permute.xlu0 %553  ;;  %1376 = vmatmul.msk.f32.vlgmr.msrb.gmra.mxu2 %vm572_vm0, %v552_v60  ;;  %v823_v60 = vld [vmem:[#allocation8] sm:$0xff] }
 0x161   : > { %1378 = vmatmul.msk.f32.vlgmr.msra.gmra.mxu3 %vm572_vm0, %v554_v61 }
 0x162   : > { %843 = vmatpush.msra.mxu3 %v838_v45  ;;  %v934_v45 = vld [vmem:[#allocation10 + $0x158] sm:$0xff] }
 0x164   : > { %844 = vmatpush.msra.mxu3 %v837_v46  ;;  %v927_v46 = vld [vmem:[#allocation10 + $0x120] sm:$0xff] }
 0x166   : > { %v594_v7 = vpop.f32.mrf.mxu0  ;;  %845 = vmatpush.msra.mxu3 %v836_v47  ;;  %v928_v47 = vld [vmem:[#allocation10 + $0x128] sm:$0xff] }
 0x167   : > { %v670_v8 = vsel %vm669_vm1, %v594_v7, -inf }
 0x168   : > { %846 = vmatpush.msra.mxu3 %v835_v48  ;;  %v929_v48 = vld [vmem:[#allocation10 + $0x130] sm:$0xff] }
 0x16a   : > { %847 = vmatpush.msra.mxu3 %v834_v49  ;;  %v930_v49 = vld [vmem:[#allocation10 + $0x138] sm:$0xff] }
 0x16c   : > { %848 = vmatpush.msra.mxu3 %v833_v50  ;;  %v923_v50 = vld [vmem:[#allocation10 + $0x100] sm:$0xff] }
 0x16e   : > { %849 = vmatpush.msra.mxu3 %v832_v51  ;;  %v924_v51 = vld [vmem:[#allocation10 + $0x108] sm:$0xff] }
 0x170   : > { %850 = vmatpush.msra.mxu3 %v831_v52  ;;  %v925_v52 = vld [vmem:[#allocation10 + $0x110] sm:$0xff] }
 0x172   : > { %851 = vmatpush.msra.mxu3 %v830_v53  ;;  %v926_v53 = vld [vmem:[#allocation10 + $0x118] sm:$0xff] }
 0x174   : > { %852 = vmatpush.msra.mxu3 %v829_v54  ;;  %v919_v54 = vld [vmem:[#allocation10 + $0xe0] sm:$0xff] }
 0x176   : > { %853 = vmatpush.msra.mxu3 %v828_v55  ;;  %v920_v55 = vld [vmem:[#allocation10 + $0xe8] sm:$0xff] }
 0x178   : > { %854 = vmatpush.msra.mxu3 %v827_v56  ;;  %v921_v56 = vld [vmem:[#allocation10 + $0xf0] sm:$0xff] }
 0x17a   : > { %855 = vmatpush.msra.mxu3 %v826_v57  ;;  %v922_v57 = vld [vmem:[#allocation10 + $0xf8] sm:$0xff] }
 0x17c   : > { %856 = vmatpush.msra.mxu3 %v825_v58  ;;  %v915_v58 = vld [vmem:[#allocation10 + $0xc0] sm:$0xff] }
 0x17e   : > { %857 = vmatpush.msra.mxu3 %v824_v59  ;;  %v916_v59 = vld [vmem:[#allocation10 + $0xc8] sm:$0xff] }
 0x180   : > { %858 = vmatpush.msra.mxu3 %v823_v60  ;;  %v917_v60 = vld [vmem:[#allocation10 + $0xd0] sm:$0xff] }
 0x1c5   : > { %v618_v1 = vpop.f32.mrf.mxu1 }
 0x1c6   : > { %v673_v2 = vsel %vm669_vm1, %v618_v1, -inf }
 0x1c7   : > { %674 = vmax.xlane.f32.xlu1 %v673_v2 }
 0x1e0   : > { %566 = vrot.lane.b32.xlu1 %v546_v0, %s1790_s17 }
 0x1e3   : > { %v642_v3 = vpop.f32.mrf.mxu2 }
 0x1e4   : > { %v666_v4 = vpop.f32.mrf.mxu3  ;;  %v676_v5 = vsel %vm669_vm1, %v642_v3, -inf }
 0x1e5   : > { %677 = vmax.xlane.f32.xlu2 %v676_v5  ;;  %v679_v6 = vsel %vm669_vm1, %v666_v4, -inf }
 0x1e6   : > { %680 = vmax.xlane.f32.xlu0 %v679_v6 }
 0x1fa   : > { %563 = vrot.lane.b32.xlu0 %v546_v0, %s1789_s3 }
 0x1fd   : > { %569 = vrot.lane.b32.xlu2 %v546_v0, %s1791_s23 }
 0x224   : > { %671 = vmax.xlane.f32.xlu0 %v670_v8 }
 0x23a   : > { %v675_v9 = vpop.xlane.xlu1 %674 }
 0x23b   : > { %v683_v10 = vsub.f32 %v618_v1, %v675_v9 }
 0x23d   : > { %v688_v11 = vmul.f32 1.442695, %v683_v10 }
 0x23f   : > { %1496 = vpow2.f32 %v688_v11  ;;  %v1792_v11 = vmov 128.0  }
 0x245   : > { %v1497_v12 = vpop.eup %1496 }
 0x246   : > { %v697_v13 = vsel %vm669_vm1, %v1497_v12, 0.0 }
 0x247   : > { %698 = vadd.xlane.f32.xlu2 %v697_v13  ;;  %v952_v13 = vld [vmem:[#allocation10 + $0x1e8] sm:$0xff] }
 0x252   : > { %v567_v14 = vpop.permute.xlu1 %566 }
 0x253   : > { %770 = vmatpush.msra.mxu1 %v567_v14  ;;  %v953_v14 = vld [vmem:[#allocation10 + $0x1f0] sm:$0xff] }
 0x255   : > { %985 = vmatpush.msrb.mxu1 %v952_v13  ;;  %v902_v13 = vld [vmem:[#allocation10 + $0x58] sm:$0xff] }
 0x258   : > { %v678_v15 = vpop.xlane.xlu2 %677 }
 0x259   : > { %v684_v16 = vsub.f32 %v642_v3, %v678_v15  ;;  %v681_v17 = vpop.xlane.xlu0 %680  ;;  %v954_v15 = vld [vmem:[#allocation10 + $0x1f8] sm:$0xff] }
 0x25a   : > { %v685_v18 = vsub.f32 %v666_v4, %v681_v17  ;;  %v948_v17 = vld [vmem:[#allocation10 + $0x1c8] sm:$0xff] }
 0x25b   : > { %v690_v19 = vmul.f32 1.442695, %v684_v16  ;;  %v947_v16 = vld [vmem:[#allocation10 + $0x1c0] sm:$0xff]  ;;  %986 = vmatpush.msrb.mxu1 %v948_v17  ;;  %v898_v17 = vld [vmem:[#allocation10 + $0x38] sm:$0xff] }
 0x25c   : > { %v692_v20 = vmul.f32 1.442695, %v685_v18  ;;  %v949_v18 = vld [vmem:[#allocation10 + $0x1d0] sm:$0xff] }
 0x25d   : > { %1498 = vpow2.f32 %v690_v19  ;;  %v950_v19 = vld [vmem:[#allocation10 + $0x1d8] sm:$0xff] }
 0x25e   : > { %1500 = vpow2.f32 %v692_v20  ;;  %v943_v20 = vld [vmem:[#allocation10 + $0x1a0] sm:$0xff] }
 0x260   : > { %v570_v21 = vpop.permute.xlu2 %569 }
 0x261   : > { %793 = vmatpush.msra.mxu2 %v570_v21  ;;  %v944_v21 = vld [vmem:[#allocation10 + $0x1a8] sm:$0xff] }
 0x262   : > { %987 = vmatpush.msrb.mxu1 %v944_v21  ;;  %v894_v21 = vld [vmem:[#allocation10 + $0x18] sm:$0xff] }
 0x263   : > { %v1499_v22 = vpop.eup %1498  ;;  %1005 = vmatpush.msrb.mxu2 %v953_v14  ;;  %v895_v14 = vld [vmem:[#allocation10 + $0x20] sm:$0xff] }
 0x264   : > { %v1501_v23 = vpop.eup %1500  ;;  %1381 = vmatmul.msk.f32.vlgmr.msra.gmra.mxu1 %vm669_vm1, %v1499_v22  ;;  %v700_v24 = vsel %vm669_vm1, %v1499_v22, 0.0  ;;  %v946_v22 = vld [vmem:[#allocation10 + $0x1b8] sm:$0xff] }
 0x265   : > { %1382 = vmatmul.msk.f32.vlgmr.msra.gmra.mxu2 %vm669_vm1, %v1501_v23  ;;  %701 = vadd.xlane.f32.xlu1 %v700_v24  ;;  %v703_v25 = vsel %vm669_vm1, %v1501_v23, 0.0  ;;  %v939_v24 = vld [vmem:[#allocation10 + $0x180] sm:$0xff] }
 0x266   : > { %704 = vadd.xlane.f32.xlu0 %v703_v25  ;;  %1006 = vmatpush.msrb.mxu2 %v949_v18  ;;  %v940_v25 = vld [vmem:[#allocation10 + $0x188] sm:$0xff]  ;;  %v891_v18 = vld [vmem:[#allocation10] sm:$0xff] }
 0x267   : > { %988 = vmatpush.msrb.mxu1 %v940_v25  ;;  %v1062_v25 = vld [vmem:[#allocation11 + $0x68] sm:$0xff] }
 0x26c   : > { %v564_v26 = vpop.permute.xlu0 %563 }
 0x26d   : > { %747 = vmatpush.msra.mxu0 %v564_v26  ;;  %v941_v26 = vld [vmem:[#allocation10 + $0x190] sm:$0xff] }
 0x26e   : > { %1380 = vmatmul.msk.f32.vlgmr.msra.gmra.mxu0 %vm669_vm1, %v1497_v12  ;;  %v951_v12 = vld [vmem:[#allocation10 + $0x1e0] sm:$0xff] }
 0x26f   : > { %965 = vmatpush.msrb.mxu0 %v951_v12  ;;  %v901_v12 = vld [vmem:[#allocation10 + $0x50] sm:$0xff] }
 0x271   : > { %966 = vmatpush.msrb.mxu0 %v947_v16  ;;  %v897_v16 = vld [vmem:[#allocation10 + $0x30] sm:$0xff] }
 0x273   : > { %967 = vmatpush.msrb.mxu0 %v943_v20  ;;  %v893_v20 = vld [vmem:[#allocation10 + $0x10] sm:$0xff] }
 0x275   : > { %968 = vmatpush.msrb.mxu0 %v939_v24  ;;  %v1079_v24 = vld [vmem:[#allocation11 + $0xf0] sm:$0xff] }
 0x297   : > { %v672_v27 = vpop.xlane.xlu0 %671 }
 0x298   : > { %v682_v28 = vsub.f32 %v594_v7, %v672_v27  ;;  %v1494_v7 = vld [vmem:[%s2095_s4] ss:$0 sm:$0xff]  ;;  %v942_v27 = vld [vmem:[#allocation10 + $0x198] sm:$0xff] }
 0x29a   : > { %v686_v29 = vmul.f32 1.442695, %v682_v28 }
 0x29c   : > { %1502 = vpow2.f32 %v686_v29 }
 0x2a2   : > { %v1503_v30 = vpop.eup %1502 }
 0x2a3   : > { %1379 = vmatmul.msk.f32.vlgmr.msrb.gmra.mxu3 %vm669_vm1, %v1503_v30  ;;  %v694_v32 = vsel %vm669_vm1, %v1503_v30, 0.0 }
 0x2a4   : > { %695 = vadd.xlane.f32.xlu2 %v694_v32  ;;  %1025 = vmatpush.msrb.mxu3 %v954_v15  ;;  %v896_v15 = vld [vmem:[#allocation10 + $0x28] sm:$0xff] }
 0x2a6   : > { %1026 = vmatpush.msrb.mxu3 %v950_v19  ;;  %v892_v19 = vld [vmem:[#allocation10 + $0x8] sm:$0xff] }
 0x2a8   : > { %1027 = vmatpush.msrb.mxu3 %v946_v22  ;;  %v1080_v22 = vld [vmem:[#allocation11 + $0xf8] sm:$0xff] }
 0x2aa   : > { %1028 = vmatpush.msrb.mxu3 %v942_v27  ;;  %v1096_v27 = vld [vmem:[#allocation11 + $0x178] sm:$0xff] }
 0x2ba   : > { %v699_v37 = vpop.xlane.xlu2 %698 }
 0x2d8   : > { %v702_v33 = vpop.xlane.xlu1 %701 }
 0x2d9   : > { %1504 = vrcp.f32 %v702_v33  ;;  %v705_v34 = vpop.xlane.xlu0 %704 }
 0x2da   : > { %1506 = vrcp.f32 %v705_v34 }
 0x2db   : > { %1508 = vrcp.f32 %v699_v37 }
 0x2df   : > { %v1505_v35 = vpop.eup %1504 }
 0x2e0   : > { %v1507_v39 = vpop.eup %1506 }
 0x2e1   : > { %v772_v36 = vpop.f32.mrf.mxu1  ;;  %v1509_v42 = vpop.eup %1508 }
 0x2e2   : > { %v804_v38 = vmul.f32 %v1505_v35, %v772_v36 }
 0x2e4   : > { %811 = vrot.lane.b32.xlu0 %v804_v38, %s1790_s17  ;;  %v935_v38 = vld [vmem:[#allocation10 + $0x160] sm:$0xff] }
 0x2e5   : > { %969 = vmatpush.msrb.mxu0 %v935_v38 }
 0x2e8   : > { %v795_v40 = vpop.f32.mrf.mxu2 }
 0x2e9   : > { %v805_v41 = vmul.f32 %v1507_v39, %v795_v40  ;;  %v936_v39 = vld [vmem:[#allocation10 + $0x168] sm:$0xff]  ;;  %v937_v40 = vld [vmem:[#allocation10 + $0x170] sm:$0xff] }
 0x2ea   : > { %989 = vmatpush.msrb.mxu1 %v936_v39  ;;  %v1060_v39 = vld [vmem:[#allocation11 + $0x58] sm:$0xff] }
 0x2eb   : > { %v749_v43 = vpop.f32.mrf.mxu0  ;;  %815 = vrot.lane.b32.xlu2 %v805_v41, %s1789_s3  ;;  %v938_v41 = vld [vmem:[#allocation10 + $0x178] sm:$0xff]  ;;  %s430_s3 = scalar_lea.vmem [#allocation13], %s1364_s18  ;;  %s1718_s18 = scalar_lea.hbm %s2100_s9, 16 }
 0x2ec   : > { %v803_v44 = vmul.f32 %v1509_v42, %v749_v43  ;;  %1029 = vmatpush.msrb.mxu3 %v938_v41  ;;  %v931_v42 = vld [vmem:[#allocation10 + $0x140] sm:$0xff]  ;;  %v932_v43 = vld [vmem:[#allocation10 + $0x148] sm:$0xff]  ;;  %s1232_s17 = sshll.u32 %s430_s3, 4  ;;  %s1233_s17 = int_to_ptr.vmem [resolvable:$true] %s1232_s17 }
 0x2ed   : > { %970 = vmatpush.msrb.mxu0 %v931_v42  ;;  %990 = vmatpush.msrb.mxu1 %v932_v43  ;;  %v1093_v42 = vld [vmem:[#allocation11 + $0x160] sm:$0xff] }
 0x2ee   : > { %807 = vrot.lane.b32.xlu1 %v803_v44, %s1791_s23  ;;  %v933_v44 = vld [vmem:[#allocation10 + $0x150] sm:$0xff]  ;;  %1030 = vmatpush.msrb.mxu3 %v934_v45  ;;  %v1109_v43 = vld [vmem:[#allocation11 + $0x1e0] sm:$0xff]  ;;  %s1234_s23 = sshll.u32 %s1230_s2, 4  ;;  %s1235_s23 = int_to_ptr.hbm [resolvable:$true] %s1234_s23 }
 0x2ef   : > { %971 = vmatpush.msrb.mxu0 %v927_v46  ;;  %991 = vmatpush.msrb.mxu1 %v928_v47  ;;  %v1075_v45 = vld [vmem:[#allocation11 + $0xd0] sm:$0xff]  ;;  %v1092_v47 = vld [vmem:[#allocation11 + $0x158] sm:$0xff]  ;;  %s1712_s14 = sshra.s32 %s1235_s23, 4  ;;  %s1713_s14 = int_to_ptr.hbm [resolvable:$true] %s1712_s14 }
 0x2f0   : > { %1031 = vmatpush.msrb.mxu3 %v930_v49  ;;  %v1058_v49 = vld [vmem:[#allocation11 + $0x48] sm:$0xff]  ;;  %s1714_s24 = scalar_lea.hbm %s1713_s14, 8  ;;  %p1719_p12 = scmp.lt.s32.totalorder %s1713_s14, %s2100_s9 }
 0x2f1   : > { %972 = vmatpush.msrb.mxu0 %v923_v50  ;;  %992 = vmatpush.msrb.mxu1 %v924_v51  ;;  %v1074_v50 = vld [vmem:[#allocation11 + $0xc8] sm:$0xff]  ;;  %v1091_v51 = vld [vmem:[#allocation11 + $0x150] sm:$0xff]  ;;  %p1715_p1 = scmp.ne.s32.totalorder %s1713_s14, %s1714_s24  ;;  %p1720_p8 = scmp.lt.s32.totalorder %s1718_s18, %s1714_s24 }
 0x2f2   : > { %1032 = vmatpush.msrb.mxu3 %v926_v53  ;;  %v1057_v53 = vld [vmem:[#allocation11 + $0x40] sm:$0xff] }
 0x2f3   : > { %973 = vmatpush.msrb.mxu0 %v919_v54  ;;  %993 = vmatpush.msrb.mxu1 %v920_v55  ;;  %v1073_v54 = vld [vmem:[#allocation11 + $0xc0] sm:$0xff]  ;;  %v1090_v55 = vld [vmem:[#allocation11 + $0x148] sm:$0xff]  ;;  %p1716_p3 = pnand %p1715_p1, %p1929_p13  ;;  %p1721_p7 = por %p1720_p8, %p1719_p12 }
 0x2f4   : > { %1033 = vmatpush.msrb.mxu3 %v922_v57  ;;  %v1056_v57 = vld [vmem:[#allocation11 + $0x38] sm:$0xff] }
 0x2f5   : > { %974 = vmatpush.msrb.mxu0 %v915_v58  ;;  %994 = vmatpush.msrb.mxu1 %v916_v59  ;;  %v1072_v58 = vld [vmem:[#allocation11 + $0xb8] sm:$0xff]  ;;  %v1089_v59 = vld [vmem:[#allocation11 + $0x140] sm:$0xff]  ;;  %p1717_p5 = pneg %p1716_p3 }
 0x2f7   : > { %p1722_p9 = pnand %p1721_p7, %p1717_p5 }
 0x317   : > { %v696_v61 = vpop.xlane.xlu2 %695 }
 0x318   : > { %1510 = vrcp.f32 %v696_v61  ;;  %v918_v61 = vld [vmem:[#allocation10 + $0xd8] sm:$0xff] }
 0x319   : > { %1512 = vrcp.f32 %v1792_v11  ;;  %1034 = vmatpush.msrb.mxu3 %v918_v61  ;;  %v900_v11 = vld [vmem:[#allocation10 + $0x48] sm:$0xff]  ;;  %v1055_v61 = vld [vmem:[#allocation11 + $0x30] sm:$0xff] }
 0x31e   : > { %v1511_v63 = vpop.eup %1510 }
 0x31f   : > { %v1513_v23 = vpop.eup %1512 }
 0x320   : > { %v867_v28 = vmul.f32 128.0, %v1513_v23  ;;  %vm871_vm4 = vweird.f32 %v1513_v23 }
 0x322   : > { %v868_v29 = vsub.f32 1.0, %v867_v28  ;;  %v1061_v28 = vld [vmem:[#allocation11 + $0x60] sm:$0xff] }
 0x324   : > { %v869_v30 = vmul.f32 %v1513_v23, %v868_v29  ;;  %v1112_v29 = vld [vmem:[#allocation11 + $0x1f8] sm:$0xff] }
 0x326   : > { %v726_v62 = vpop.f32.mrf.mxu3  ;;  %v870_v32 = vadd.f32 %v1513_v23, %v869_v30  ;;  %v1077_v30 = vld [vmem:[#allocation11 + $0xe0] sm:$0xff] }
 0x327   : > { %v802_v0 = vmul.f32 %v1511_v63, %v726_v62  ;;  %v911_v62 = vld [vmem:[#allocation10 + $0xa0] sm:$0xff]  ;;  %v912_v63 = vld [vmem:[#allocation10 + $0xa8] sm:$0xff] }
 0x328   : > { %v2027_v33 = vsel %vm871_vm4, %v1513_v23, %v870_v32  ;;  %975 = vmatpush.msrb.mxu0 %v911_v62  ;;  %995 = vmatpush.msrb.mxu1 %v912_v63  ;;  %v1063_v23 = vld [vmem:[#allocation11 + $0x70] sm:$0xff] }
 0x329   : > { %v1095_v32 = vld [vmem:[#allocation11 + $0x170] sm:$0xff] }
 0x32a   : > { %v1071_v62 = vld [vmem:[#allocation11 + $0xb0] sm:$0xff] }
 0x345   : > { %v816_v4 = vpop.permute.xlu2 %815 }
 0x356   : > { %v812_v2 = vpop.permute.xlu0 %811 }
 0x360   : > { %v808_v1 = vpop.permute.xlu1 %807 }
 0x361   : > { %v818_v3 = vsel %vm572_vm0, %v802_v0, %v808_v1  ;;  %v913_v0 = vld [vmem:[#allocation10 + $0xb0] sm:$0xff]  ;;  %v914_v1 = vld [vmem:[#allocation10 + $0xb8] sm:$0xff] }
 0x362   : > { %v820_v5 = vsel %vm819_vm2, %v818_v3, %v812_v2  ;;  %1035 = vmatpush.msrb.mxu3 %v914_v1  ;;  %v907_v2 = vld [vmem:[#allocation10 + $0x80] sm:$0xff]  ;;  %v908_v3 = vld [vmem:[#allocation10 + $0x88] sm:$0xff]  ;;  %v1104_v1 = vld [vmem:[#allocation11 + $0x1b8] sm:$0xff] }
 0x363   : > { %v822_v6 = vsel %vm821_vm3, %v820_v5, %v816_v4  ;;  %v909_v4 = vld [vmem:[#allocation10 + $0x90] sm:$0xff]  ;;  %976 = vmatpush.msrb.mxu0 %v907_v2  ;;  %996 = vmatpush.msrb.mxu1 %v908_v3  ;;  %v910_v5 = vld [vmem:[#allocation10 + $0x98] sm:$0xff]  ;;  %v1054_v3 = vld [vmem:[#allocation11 + $0x28] sm:$0xff] }
 0x364   : > { %859 = vmatmul.f32.vlgmr.msra.gmra.mxu3 %v822_v6  ;;  %v903_v6 = vld [vmem:[#allocation10 + $0x60] sm:$0xff] }
 0x365   : > { %1036 = vmatpush.msrb.mxu3 %v910_v5  ;;  %977 = vmatpush.msrb.mxu0 %v903_v6  ;;  %v1087_v5 = vld [vmem:[#allocation11 + $0x130] sm:$0xff] }
 0x366   : > { %v1103_v6 = vld [vmem:[#allocation11 + $0x1b0] sm:$0xff] }
 0x3e7   : > { %v860_v8 = vpop.f32.mrf.mxu3 }
 0x3e8   : > { %v861_v9 = vadd.f32 %v1494_v7, %v860_v8  ;;  %v904_v7 = vld [vmem:[#allocation10 + $0x68] sm:$0xff]  ;;  %v905_v8 = vld [vmem:[#allocation10 + $0x70] sm:$0xff] }
 0x3e9   : > { %997 = vmatpush.msrb.mxu1 %v904_v7 }
 0x3ea   : > { %v863_v10 = vadd.f32 %v861_v9, %v1985_v31  ;;  %v945_v31 = vld [vmem:[#allocation10 + $0x1b0] sm:$0xff]  ;;  %v906_v9 = vld [vmem:[#allocation10 + $0x78] sm:$0xff] }
 0x3eb   : > { %1007 = vmatpush.msrb.mxu2 %v945_v31  ;;  %1037 = vmatpush.msrb.mxu3 %v906_v9  ;;  %v1064_v31 = vld [vmem:[#allocation11 + $0x78] sm:$0xff]  ;;  %v1069_v9 = vld [vmem:[#allocation11 + $0xa0] sm:$0xff] }
 0x3ec   : > { %864 = vadd.xlane.f32.xlu0 %v863_v10  ;;  %998 = vmatpush.msrb.mxu1 %v900_v11  ;;  %v1052_v11 = vld [vmem:[#allocation11 + $0x18] sm:$0xff] }
 0x3ed   : > { %1008 = vmatpush.msrb.mxu2 %v941_v26  ;;  %1038 = vmatpush.msrb.mxu3 %v902_v13  ;;  %v1078_v26 = vld [vmem:[#allocation11 + $0xe8] sm:$0xff] }
 0x3ee   : > { %999 = vmatpush.msrb.mxu1 %v896_v15 }
 0x3ef   : > { %1009 = vmatpush.msrb.mxu2 %v937_v40  ;;  %1039 = vmatpush.msrb.mxu3 %v898_v17  ;;  %v1076_v40 = vld [vmem:[#allocation11 + $0xd8] sm:$0xff]  ;;  %v1051_v17 = vld [vmem:[#allocation11 + $0x10] sm:$0xff] }
 0x3f0   : > { %1000 = vmatpush.msrb.mxu1 %v892_v19  ;;  %v1086_v19 = vld [vmem:[#allocation11 + $0x128] sm:$0xff] }
 0x3f1   : > { %1010 = vmatpush.msrb.mxu2 %v933_v44  ;;  %1040 = vmatpush.msrb.mxu3 %v894_v21  ;;  %v1059_v44 = vld [vmem:[#allocation11 + $0x50] sm:$0xff]  ;;  %v1050_v21 = vld [vmem:[#allocation11 + $0x8] sm:$0xff] }
 0x3f2   : > { %1137 = vmatpush.msra.mxu1 %v1080_v22  ;;  %v1101_v22 = vld [vmem:[#allocation11 + $0x1a0] sm:$0xff] }
 0x3f3   : > { %1011 = vmatpush.msrb.mxu2 %v929_v48  ;;  %1177 = vmatpush.msra.mxu3 %v1112_v29  ;;  %v1108_v48 = vld [vmem:[#allocation11 + $0x1d8] sm:$0xff]  ;;  %v1082_v29 = vld [vmem:[#allocation11 + $0x108] sm:$0xff] }
 0x3f4   : > { %1138 = vmatpush.msra.mxu1 %v1079_v24  ;;  %v1065_v24 = vld [vmem:[#allocation11 + $0x80] sm:$0xff] }
 0x3f5   : > { %1012 = vmatpush.msrb.mxu2 %v925_v52  ;;  %v1107_v52 = vld [vmem:[#allocation11 + $0x1d0] sm:$0xff] }
 0x3f6   : > { %1139 = vmatpush.msra.mxu1 %v1078_v26  ;;  %v1100_v26 = vld [vmem:[#allocation11 + $0x198] sm:$0xff] }
 0x3f7   : > { %1013 = vmatpush.msrb.mxu2 %v921_v56  ;;  %v1106_v56 = vld [vmem:[#allocation11 + $0x1c8] sm:$0xff] }
 0x3f8   : > { %1140 = vmatpush.msra.mxu1 %v1077_v30  ;;  %v1098_v30 = vld [vmem:[#allocation11 + $0x188] sm:$0xff] }
 0x3f9   : > { %1014 = vmatpush.msrb.mxu2 %v917_v60  ;;  %v1105_v60 = vld [vmem:[#allocation11 + $0x1c0] sm:$0xff] }
 0x3fa   : > { %1141 = vmatpush.msra.mxu1 %v1076_v40 }
 0x3fb   : > { %1015 = vmatpush.msrb.mxu2 %v913_v0  ;;  %v1088_v0 = vld [vmem:[#allocation11 + $0x138] sm:$0xff] }
 0x3fc   : > { %1142 = vmatpush.msra.mxu1 %v1075_v45 }
 0x3fd   : > { %1016 = vmatpush.msrb.mxu2 %v909_v4  ;;  %v1070_v4 = vld [vmem:[#allocation11 + $0xa8] sm:$0xff] }
 0x3fe   : > { %1143 = vmatpush.msra.mxu1 %v1074_v50 }
 0x3ff   : > { %1017 = vmatpush.msrb.mxu2 %v905_v8  ;;  %v1053_v8 = vld [vmem:[#allocation11 + $0x20] sm:$0xff] }
 0x400   : > { %1144 = vmatpush.msra.mxu1 %v1073_v54 }
 0x401   : > { %1018 = vmatpush.msrb.mxu2 %v901_v12  ;;  %v1068_v12 = vld [vmem:[#allocation11 + $0x98] sm:$0xff] }
 0x402   : > { %1145 = vmatpush.msra.mxu1 %v1072_v58 }
 0x403   : > { %1019 = vmatpush.msrb.mxu2 %v897_v16 }
 0x404   : > { %1146 = vmatpush.msra.mxu1 %v1071_v62 }
 0x405   : > { %1020 = vmatpush.msrb.mxu2 %v893_v20  ;;  %v1102_v20 = vld [vmem:[#allocation11 + $0x1a8] sm:$0xff] }
 0x406   : > { %1147 = vmatpush.msra.mxu1 %v1070_v4 }
 0x407   : > { %1157 = vmatpush.msra.mxu2 %v1096_v27  ;;  %v1083_v27 = vld [vmem:[#allocation11 + $0x110] sm:$0xff] }
 0x408   : > { %1148 = vmatpush.msra.mxu1 %v1069_v9 }
 0x409   : > { %1158 = vmatpush.msra.mxu2 %v1095_v32  ;;  %v1081_v32 = vld [vmem:[#allocation11 + $0x100] sm:$0xff] }
 0x40a   : > { %1149 = vmatpush.msra.mxu1 %v1068_v12 }
 0x45f   : > { %v865_v34 = vpop.xlane.xlu0 %864 }
 0x460   : > { %v873_v35 = vmul.f32 %v2027_v33, %v865_v34  ;;  %v1111_v34 = vld [vmem:[#allocation11 + $0x1f0] sm:$0xff] }
 0x461   : > { %1178 = vmatpush.msra.mxu3 %v1111_v34  ;;  %v1097_v34 = vld [vmem:[#allocation11 + $0x180] sm:$0xff] }
 0x462   : > { %v2030_v36 = vsub.f32 %v863_v10, %v873_v35  ;;  %v899_v10 = vld [vmem:[#allocation10 + $0x40] sm:$0xff]  ;;  %v1094_v35 = vld [vmem:[#allocation11 + $0x168] sm:$0xff] }
 0x463   : > { %978 = vmatpush.msrb.mxu0 %v899_v10  ;;  %1159 = vmatpush.msra.mxu2 %v1094_v35  ;;  %v955_v35 = vld [vmem:[%s2097_s6] sm:$0xf] }
 0x464   : > { %v875_v37 = vmul.f32 %v2030_v36, %v2030_v36  ;;  %v959_v45 = vperm.slane %v955_v35, 2 }
 0x465   : > { %979 = vmatpush.msrb.mxu0 %v895_v14  ;;  %1160 = vmatpush.msra.mxu2 %v1093_v42 }
 0x466   : > { %876 = vadd.xlane.f32.xlu1 %v875_v37  ;;  %v1110_v37 = vld [vmem:[#allocation11 + $0x1e8] sm:$0xff] }
 0x467   : > { %980 = vmatpush.msrb.mxu0 %v891_v18  ;;  %1179 = vmatpush.msra.mxu3 %v1110_v37  ;;  %v1067_v18 = vld [vmem:[#allocation11 + $0x90] sm:$0xff]  ;;  %v957_v37 = vperm.slane %v955_v35, 0 }
 0x468   : > { %1161 = vmatpush.msra.mxu2 %v1092_v47  ;;  %1150 = vmatpush.msra.mxu1 %v1067_v18 }
 0x469   : > { %1117 = vmatpush.msra.mxu0 %v1064_v31  ;;  %1180 = vmatpush.msra.mxu3 %v1109_v43  ;;  %v1066_v31 = vld [vmem:[#allocation11 + $0x88] sm:$0xff] }
 0x46a   : > { %1162 = vmatpush.msra.mxu2 %v1091_v51  ;;  %1151 = vmatpush.msra.mxu1 %v1066_v31 }
 0x46b   : > { %1118 = vmatpush.msra.mxu0 %v1063_v23  ;;  %1181 = vmatpush.msra.mxu3 %v1108_v48  ;;  %v1049_v23 = vld [vmem:[#allocation11] sm:$0xff] }
 0x46c   : > { %1163 = vmatpush.msra.mxu2 %v1090_v55  ;;  %1152 = vmatpush.msra.mxu1 %v1065_v24 }
 0x46d   : > { %1119 = vmatpush.msra.mxu0 %v1062_v25  ;;  %1182 = vmatpush.msra.mxu3 %v1107_v52  ;;  %v1084_v25 = vld [vmem:[#allocation11 + $0x118] sm:$0xff] }
 0x46e   : > { %1164 = vmatpush.msra.mxu2 %v1089_v59 }
 0x46f   : > { %1120 = vmatpush.msra.mxu0 %v1061_v28  ;;  %1183 = vmatpush.msra.mxu3 %v1106_v56  ;;  %v1099_v28 = vld [vmem:[#allocation11 + $0x190] sm:$0xff] }
 0x470   : > { %1165 = vmatpush.msra.mxu2 %v1088_v0 }
 0x471   : > { %1121 = vmatpush.msra.mxu0 %v1060_v39  ;;  %1184 = vmatpush.msra.mxu3 %v1105_v60 }
 0x472   : > { %1166 = vmatpush.msra.mxu2 %v1087_v5 }
 0x473   : > { %1122 = vmatpush.msra.mxu0 %v1059_v44  ;;  %1185 = vmatpush.msra.mxu3 %v1104_v1 }
 0x474   : > { %1167 = vmatpush.msra.mxu2 %v1086_v19 }
 0x475   : > { %1123 = vmatpush.msra.mxu0 %v1058_v49  ;;  %1186 = vmatpush.msra.mxu3 %v1103_v6 }
 0x477   : > { %1124 = vmatpush.msra.mxu0 %v1057_v53  ;;  %1187 = vmatpush.msra.mxu3 %v1102_v20  ;;  %v1495_v53 = vld [vmem:[%s2099_s8] ss:$0 sm:$0xff] }
 0x479   : > { %1125 = vmatpush.msra.mxu0 %v1056_v57  ;;  %1188 = vmatpush.msra.mxu3 %v1101_v22 }
 0x47b   : > { %1126 = vmatpush.msra.mxu0 %v1055_v61  ;;  %1189 = vmatpush.msra.mxu3 %v1100_v26 }
 0x47d   : > { %1127 = vmatpush.msra.mxu0 %v1054_v3  ;;  %1190 = vmatpush.msra.mxu3 %v1099_v28 }
 0x47f   : > { %1128 = vmatpush.msra.mxu0 %v1053_v8  ;;  %1191 = vmatpush.msra.mxu3 %v1098_v30 }
 0x481   : > { %1129 = vmatpush.msra.mxu0 %v1052_v11  ;;  %1192 = vmatpush.msra.mxu3 %v1097_v34 }
 0x483   : > { %1130 = vmatpush.msra.mxu0 %v1051_v17 }
 0x485   : > { %1131 = vmatpush.msra.mxu0 %v1050_v21 }
 0x487   : > { %1132 = vmatpush.msra.mxu0 %v1049_v23 }
 0x4d9   : > { %v877_v38 = vpop.xlane.xlu1 %876 }
 0x4da   : > { %v878_v41 = vmul.f32 %v877_v38, %v2027_v33  ;;  %v958_v38 = vperm.slane %v955_v35, 1 }
 0x4dc   : > { %v2035_v46 = vadd.f32 1e-05, %v878_v41 }
 0x4de   : > { %1514 = vrsqrt.f32 %v2035_v46  ;;  %vm886_vm6 = vweird.f32 %v2035_v46 }
 0x4e4   : > { %v1515_v63 = vpop.eup %1514 }
 0x4e5   : > { %v881_v2 = vmul.f32 %v1515_v63, %v2035_v46  ;;  %vm887_vm5 = vweird.f32 %v1515_v63  ;;  %v960_v46 = vperm.slane %v955_v35, 3 }
 0x4e6   : > { %vm888_vm7 = vmor %vm886_vm6, %vm887_vm5 }
 0x4e7   : > { %v882_v7 = vmul.f32 %v1515_v63, %v881_v2 }
 0x4e9   : > { %v883_v10 = vmul.f32 0.5, %v882_v7 }
 0x4eb   : > { %v884_v13 = vsub.f32 1.5, %v883_v10 }
 0x4ed   : > { %v885_v14 = vmul.f32 %v1515_v63, %v884_v13 }
 0x4ef   : > { %v889_v15 = vsel %vm888_vm7, %v1515_v63, %v885_v14 }
 0x4f0   : > { %v2041_v16 = vmul.f32 %v889_v15, %v2030_v36  ;;  %v1085_v36 = vld [vmem:[#allocation11 + $0x120] sm:$0xff] }
 0x4f1   : > { %1168 = vmatpush.msra.mxu2 %v1085_v36 }
 0x4f2   : > { %981 = vmatmul.f32.vlgmr.msrb.gmra.mxu0 %v2041_v16  ;;  %1001 = vmatmul.f32.vlgmr.msrb.gmra.mxu1 %v2041_v16 }
 0x4f3   : > { %1021 = vmatmul.f32.vlgmr.msrb.gmra.mxu2 %v2041_v16  ;;  %1041 = vmatmul.f32.vlgmr.msrb.gmra.mxu3 %v2041_v16 }
 0x4f4   : > { %1169 = vmatpush.msra.mxu2 %v1084_v25 }
 0x4f6   : > { %1170 = vmatpush.msra.mxu2 %v1083_v27 }
 0x4f8   : > { %1171 = vmatpush.msra.mxu2 %v1082_v29 }
 0x4fa   : > { %1172 = vmatpush.msra.mxu2 %v1081_v32 }
 0x56f   : > { %v982_v39 = vpop.f32.mrf.mxu0  ;;  %v1002_v40 = vpop.f32.mrf.mxu1 }
 0x570   : > { %v983_v41 = vadd.f32 %v982_v39, %v957_v37  ;;  %v1003_v42 = vadd.f32 %v1002_v40, %v958_v38 }
 0x572   : > { %v1045_v43 = vmax.f32 %v983_v41, 0.0  ;;  %v1046_v44 = vmax.f32 %v1003_v42, 0.0 }
 0x574   : > { %1133 = vmatmul.f32.vlgmr.msra.gmra.mxu0 %v1045_v43  ;;  %1153 = vmatmul.f32.vlgmr.msra.gmra.mxu1 %v1046_v44 }
 0x576   : > { %v1022_v47 = vpop.f32.mrf.mxu2  ;;  %v1042_v48 = vpop.f32.mrf.mxu3 }
 0x577   : > { %v1023_v49 = vadd.f32 %v1022_v47, %v959_v45  ;;  %v1043_v50 = vadd.f32 %v1042_v48, %v960_v46 }
 0x579   : > { %v1047_v51 = vmax.f32 %v1023_v49, 0.0  ;;  %v1048_v52 = vmax.f32 %v1043_v50, 0.0 }
 0x57b   : > { %1173 = vmatmul.f32.vlgmr.msra.gmra.mxu2 %v1047_v51  ;;  %1193 = vmatmul.f32.vlgmr.msra.gmra.mxu3 %v1048_v52 }
 0x5f1   : > { %v1134_v54 = vpop.f32.mrf.mxu0  ;;  %v1154_v56 = vpop.f32.mrf.mxu1 }
 0x5f2   : > { %v1135_v55 = vadd.f32 %v1495_v53, %v1134_v54 }
 0x5f4   : > { %v1155_v57 = vadd.f32 %v1154_v56, %v1135_v55 }
 0x5fe   : > { %v1174_v58 = vpop.f32.mrf.mxu2  ;;  %v1194_v60 = vpop.f32.mrf.mxu3 }
 0x5ff   : > { %v1175_v59 = vadd.f32 %v1174_v58, %v1155_v57 }
 0x601   : > { %v1195_v61 = vadd.f32 %v1194_v60, %v1175_v59 }
 0x603   : > { %v1197_v62 = vadd.f32 %v1195_v61, %v2041_v16 }
 0x605   : > { %1198 = vadd.xlane.f32.xlu2 %v1197_v62 }
 0x678   : > { %v1199_v63 = vpop.xlane.xlu2 %1198 }
 0x679   : > { %v1200_v0 = vmul.f32 %v1199_v63, %v2027_v33 }
 0x67b   : > { %v1201_v1 = vsub.f32 %v1197_v62, %v1200_v0 }
 0x67d   : > { %v1202_v2 = vmul.f32 %v1201_v1, %v1201_v1 }
 0x67f   : > { %1203 = vadd.xlane.f32.xlu0 %v1202_v2 }
 0x6f2   : > { %v1204_v3 = vpop.xlane.xlu0 %1203 }
 0x6f3   : > { %v1205_v4 = vmul.f32 %v1204_v3, %v2027_v33 }
 0x6f5   : > { %v1206_v5 = vadd.f32 1e-05, %v1205_v4 }
 0x6f7   : > { %1516 = vrsqrt.f32 %v1206_v5  ;;  %vm1213_vm9 = vweird.f32 %v1206_v5 }
 0x6fd   : > { %v1517_v6 = vpop.eup %1516 }
 0x6fe   : > { %v1208_v7 = vmul.f32 %v1517_v6, %v1206_v5  ;;  %vm1214_vm8 = vweird.f32 %v1517_v6 }
 0x6ff   : > { %vm1215_vm10 = vmor %vm1213_vm9, %vm1214_vm8 }
 0x700   : > { %v1209_v8 = vmul.f32 %v1517_v6, %v1208_v7 }
 0x702   : > { %v1210_v9 = vmul.f32 0.5, %v1209_v8 }
 0x704   : > { %v1211_v10 = vsub.f32 1.5, %v1210_v9 }
 0x706   : > { %v1212_v11 = vmul.f32 %v1517_v6, %v1211_v10 }
 0x708   : > { %v1216_v33 = vsel %vm1215_vm10, %v1517_v6, %v1212_v11 }
 0x709   : > { %v1217_v12 = vmul.f32 %v1216_v33, %v1201_v1 }
 0x70b   : > { %1218 = vst [vmem:[%s430_s3] sm:$0xff] %v1217_v12 }
 0x70c   : > { %1725 = shalt.err (!%p1722_p9)
}
 0x70d   : > { %1409 = dma.vmem_to_hbm [thread:$0]  (%p1929_p13), %s1233_s17, 128, %s1235_s23, %s1220_s16  }
 0x70e PF: > { %s1246_s29 = sand.u32 1, %s1764_s30   ;;  %p2113_p10 = scmp.ge.s32.totalorder %s1776_s12, 2 }
 0x70f   : > { %s1247_s27 = scalar_lea.sflag [#allocation4], %s1246_s29 }
 0x710   : > { %p1432_p11 = pnand %p2113_p10, %p1934_p4 }
 0x712   : > { %p1433_p0 = pneg %p1432_p11 }
 0x714   : > { %1759 = dma.done.wait (%p1433_p0), %s1247_s27, 128  }
 0x715   : > { %1761 = vsyncadd (%p1433_p0), %s1247_s27, 4294967168  ;;  %p25_p2 = scmp.ge.s32.totalorder %s1909_s21, 4   ;;  %s2114_s30 = smov %s1768_s10 }
 0x716   : > { %s2115_s10 = smov %s1772_s11  ;;  %s2116_s11 = smov %s1921_s19 }
 0x717   : > { %s2117_s12 = smov %s1909_s21  ;;  %27 = sbr.rel (!%p25_p2) target bundleno = 12 (0xc), region = 121 }
 0x71c   :  { %1253 = vsyncpa [#allocation3], 1 }
 0x71d   :  { %1255 = vsyncpa [#allocation3 + $0x1], 1 }
 0x71e   :  { %1256 = vsyncpa [#allocation6], 1 }
 0x71f   :  { %1257 = vsyncpa [#allocation9], 1 }
 0x720   :  { %1258 = vsyncpa [#allocation12], 1 }
 0x721   :  { %1259 = vsyncpa [#allocation4], 1 }
 0x722   :  { %1261 = vsyncpa [#allocation4 + $0x1], 1 }

// kernel: tpu_custom_call.1
= control target key start
LH: loop header
LB: loop body
LE: loop exit
PB: predicated region body
PF: predicated region fallthrough
CT: control target
= control target key end

     0   :  { %s2091_s0 = inlined_call_operand.hbm [shape: f32[2,8,128], index: 0, kind: input, shape index: {}]   ;;  %s2092_s1 = inlined_call_operand.hbm [shape: f32[128,384], index: 1, kind: input, shape index: {}]   ;;  %s2093_s2 = inlined_call_operand.hbm [shape: f32[1,384], index: 2, kind: input, shape index: {}]   ;;  %s2094_s3 = inlined_call_operand.hbm [shape: f32[128,128], index: 3, kind: input, shape index: {}]   ;;  %s2095_s4 = inlined_call_operand.vmem [shape: f32[1,128], index: 4, kind: input, shape index: {}]   ;;  %s2096_s5 = inlined_call_operand.hbm [shape: f32[128,512], index: 5, kind: input, shape index: {}]   ;;  %s2097_s6 = inlined_call_operand.vmem [shape: f32[1,512], index: 6, kind: input, shape index: {}]   ;;  %s2098_s7 = inlined_call_operand.hbm [shape: f32[512,128], index: 7, kind: input, shape index: {}]   ;;  %s2099_s8 = inlined_call_operand.vmem [shape: f32[1,128], index: 8, kind: input, shape index: {}]   ;;  %s2100_s9 = inlined_call_operand.hbm [shape: f32[2,8,128], index: 9, kind: output, shape index: {}]  }
   0x1   :  { %2101 = sst [smem:[#allocation19_spill]] %s2092_s1 }
   0x2   :  { %2102 = sst [smem:[#allocation20_spill]] %s2093_s2 }
   0x3   :  { %2103 = sst [smem:[#allocation21_spill]] %s2094_s3 }
   0x4   :  { %14 = vsyncpa [#allocation3], 0 }
   0x5   :  { %16 = vsyncpa [#allocation3 + $0x1], 0 }
   0x6   :  { %17 = vsyncpa [#allocation6], 0 }
   0x7   :  { %18 = vsyncpa [#allocation9], 0 }
   0x8   :  { %19 = vsyncpa [#allocation12], 0 }
   0x9   :  { %20 = vsyncpa [#allocation4], 0 }
   0xa   :  { %22 = vsyncpa [#allocation4 + $0x1], 0  ;;  %s1843_s30 = smov 0   ;;  %s1845_s10 = smov 0  }
   0xb   :  { %s1847_s11 = smov 0   ;;  %s1849_s12 = smov 0  }
   0xc LB: > { %s2104_s1 = sld [smem:[#allocation19_spill]]  ;;  %s1867_s16 = sadd.s32 4294967295, %s1776_s12   ;;  %s1776_s12 = sphi %s1849_s12, %s2117_s12   ;;  %s1772_s11 = sphi %s1847_s11, %s2116_s11   ;;  %s1768_s10 = sphi %s1845_s10, %s2115_s10   ;;  %s1764_s30 = sphi %s1843_s30, %s2114_s30  }
   0xd   : > { %p1354_p0 = scmp.ge.s32.totalorder %s1776_s12, 1  ;;  %p49_p1 = scmp.eq.s32.totalorder %s1867_s16, 0 }
   0xe   : > { %p253_p2 = scmp.lt.s32.totalorder %s1776_s12, 3  ;;  %s1778_s18 = smov [#allocation5]  }
   0xf   : > { %s266_s19 = sshll.u32 %s1778_s18, 4  ;;  %s2106_s3 = sld [smem:[#allocation21_spill]]  ;;  %s267_s19 = int_to_ptr.vmem [resolvable:$true] %s266_s19 }
  0x10   : > { %p1872_p3 = pnand %p1354_p0, %p253_p2  ;;  %s1779_s24 = smov [#allocation8]  }
  0x11   : > { %s292_s25 = sshll.u32 %s1779_s24, 4  ;;  %s1780_s26 = smov 384   ;;  %s293_s25 = int_to_ptr.vmem [resolvable:$true] %s292_s25 }
  0x12   : > { %s264_s15 = sshll.u32 %s2104_s1, 4  ;;  %p1411_p4 = pneg %p1872_p3  ;;  %s265_s15 = int_to_ptr.hbm [resolvable:$true] %s264_s15 }
  0x13   : > { %s1781_s27 = smov 24   ;;  %s1782_s28 = smov 128  }
  0x14   : > { %p1884_p6 = pnand %p1411_p4, %p49_p1  ;;  %s1783_s29 = smov 8  }
  0x15   : > { %s290_s22 = sshll.u32 %s2106_s3, 4  ;;  %s2108_s2 = sld [smem:[#allocation20_spill]]  ;;  %s291_s22 = int_to_ptr.hbm [resolvable:$true] %s290_s22 }
  0x16   : > { %1414 = dma.hbm_to_vmem [thread:$0]  (!%p1884_p6), %s265_s15, 6144, %s267_s19, [#allocation6], %s1780_s26, %s1780_s26, %s1781_s27  }
  0x17   : > { %1420 = dma.hbm_to_vmem [thread:$0]  (!%p1884_p6), %s291_s22, 2048, %s293_s25, [#allocation9], %s1782_s28, %s1782_s28, %s1783_s29  }
  0x18   : > { %s1784_s20 = smov [#allocation7]   ;;  %s307_s15 = sshll.u32 %s2096_s5, 4  ;;  %s308_s15 = int_to_ptr.hbm [resolvable:$true] %s307_s15 }
  0x19   : > { %s281_s21 = sshll.u32 %s1784_s20, 4  ;;  %s1785_s19 = smov [#allocation10]   ;;  %s282_s21 = int_to_ptr.vmem [resolvable:$true] %s281_s21 }
  0x1a   : > { %s309_s22 = sshll.u32 %s1785_s19, 4  ;;  %s1786_s25 = smov 512   ;;  %s310_s22 = int_to_ptr.vmem [resolvable:$true] %s309_s22 }
  0x1b   : > { %s279_s18 = sshll.u32 %s2108_s2, 4  ;;  %s1787_s26 = smov 32   ;;  %s280_s18 = int_to_ptr.hbm [resolvable:$true] %s279_s18 }
  0x1c   : > { %1417 = dma.hbm_to_vmem [thread:$0]  (!%p1884_p6), %s280_s18, 48, %s282_s21, [#allocation6]  }
  0x1d   : > { %1423 = dma.hbm_to_vmem [thread:$0]  (!%p1884_p6), %s308_s15, 8192, %s310_s22, [#allocation9], %s1786_s25, %s1786_s25, %s1787_s26  }
  0x1e   : > { %s324_s13 = sshll.u32 %s2098_s7, 4  ;;  %s1788_s14 = smov [#allocation11]   ;;  %s325_s13 = int_to_ptr.hbm [resolvable:$true] %s324_s13 }
  0x1f   : > { %s326_s18 = sshll.u32 %s1788_s14, 4  ;;  %s1353_s20 = sadd.s32 4294967294, %s1776_s12   ;;  %s327_s18 = int_to_ptr.vmem [resolvable:$true] %s326_s18 }
  0x20   : > { %1426 = dma.hbm_to_vmem [thread:$0]  (!%p1884_p6), %s325_s13, 8192, %s327_s18, [#allocation12], %s1782_s28, %s1782_s28, %s1783_s29  }
  0x21   : > { %s1909_s21 = sadd.s32 1, %s1776_s12   ;;  %s35_s24 = sadd.s32 1, %s1772_s11 }
  0x22   : > { %s32_s15 = ssub.s32 %s1776_s12, %s1909_s21  ;;  %p42_p7 = scmp.ne.s32.totalorder %s1772_s11, %s1768_s10 }
  0x23   : > { %p33_p8 = scmp.eq.s32.totalorder %s32_s15, 0  ;;  %p43_p9 = scmp.eq.s32.totalorder %s1776_s12, 0 }
  0x24   : > { %p48_p10 = scmp.ne.s32.totalorder %s1768_s10, %s1764_s30  ;;  %p240_p11 = scmp.eq.s32.totalorder %s1867_s16, 1 }
  0x25   : > { %s1921_s19 = scalar_select %p33_p8, %s1772_s11, %s35_s24  }
  0x26   : > { %p1925_p12 = por %p49_p1, %p48_p10  ;;  %p1929_p13 = por %p240_p11, %p42_p7 }
  0x27   : > { %p246_p0 = scmp.eq.s32.totalorder %s1353_s20, 1  ;;  %p44_p2 = por %p43_p9, %p42_p7 }
  0x28   : > { %s343_s29 = sand.u32 1, %s1772_s11   ;;  %p1440_p6 = scmp.lt.s32.totalorder %s1776_s12, 2 }
  0x29   : > { %p1934_p4 = por %p246_p0, %p48_p10  ;;  %s1361_s25 = sshll.u32 %s343_s29, 3 }
  0x2a   : > { %s1362_s26 = sshll.u32 %s1776_s12, 3  ;;  %s347_s18 = scalar_lea.vmem [#allocation2], %s1361_s25 }
  0x2b   : > { %s351_s13 = scalar_lea.hbm %s2091_s0, %s1362_s26  ;;  %s355_s24 = sshll.u32 %s347_s18, 4  ;;  %s356_s24 = int_to_ptr.vmem [resolvable:$true] %s355_s24 }
  0x2c   : > { %s353_s14 = sshll.u32 %s351_s13, 4  ;;  %p1943_p8 = pnand %p1440_p6, %p44_p2  ;;  %s354_s14 = int_to_ptr.hbm [resolvable:$true] %s353_s14 }
  0x2d   : > { %s344_s15 = scalar_lea.sflag [#allocation3], %s343_s29  ;;  %s1668_s2 = sshra.s32 %s354_s14, 4  ;;  %s1669_s2 = int_to_ptr.hbm [resolvable:$true] %s1668_s2 }
  0x2e   : > { %s1670_s3 = scalar_lea.hbm %s1669_s2, 8  ;;  %p1672_p9 = pneg %p1943_p8 }
  0x2f   : > { %p1671_p7 = scmp.ne.s32.totalorder %s1669_s2, %s1670_s3  ;;  %s1675_s25 = scalar_lea.hbm %s2091_s0, 16 }
  0x30   : > { %p1676_p0 = scmp.lt.s32.totalorder %s1669_s2, %s2091_s0  ;;  %p1677_p2 = scmp.lt.s32.totalorder %s1675_s25, %s1670_s3 }
  0x31   : > { %p1673_p10 = pnand %p1672_p9, %p1671_p7 }
  0x32   : > { %p1678_p6 = por %p1677_p2, %p1676_p0 }
  0x33   : > { %p1674_p11 = pneg %p1673_p10 }
  0x35   : > { %p1679_p5 = pnand %p1678_p6, %p1674_p11 }
  0x37   : > { %1682 = shalt.err (!%p1679_p5)
}
  0x38   : > { %1430 = dma.hbm_to_vmem [thread:$0]  (!%p1943_p8), %s354_s14, 128, %s356_s24, %s344_s15  }
  0x39   : > { %364 = sbr.rel (%p1872_p3) target bundleno = 1806 (0x70e), region = 56  ;;  %s1960_s29 = sand.u32 (!%p1872_p3), 1, %s1768_s10  }
  0x3a   : > { %s1364_s18 = sshll.u32 (!%p1872_p3), %s1960_s29, 3  ;;  %s367_s26 = scalar_lea.sflag (!%p1872_p3), [#allocation3], %s1960_s29 }
  0x3b   : > { %s1966_s2 = scalar_lea.vmem (!%p1872_p3), [#allocation2], %s1364_s18 }
  0x3e   : > { %1743 = dma.done.wait (%p1925_p12), %s367_s26, 128  }
  0x3f   : > { %1745 = vsyncadd (%p1925_p12), %s367_s26, 4294967168 }
  0x40   : > { %1747 = dma.done.wait (%p49_p1), [#allocation6], 6192  }
  0x41   : > { %1749 = vsyncadd (%p49_p1), [#allocation6], 4294961104 }
  0x42   : > { %1751 = dma.done.wait (%p49_p1), [#allocation9], 10240  }
  0x43   : > { %1753 = vsyncadd (%p49_p1), [#allocation9], 4294957056 }
  0x44   : > { %1755 = dma.done.wait (%p49_p1), [#allocation12], 8192  }
  0x45   : > { %1757 = vsyncadd (%p49_p1), [#allocation12], 4294959104  ;;  %v478_v0 = vld [vmem:[#allocation5 + $0x170] sm:$0xff]  ;;  %v475_v1 = vld [vmem:[#allocation5 + $0x158] sm:$0xff]  ;;  %vm572_vm0 = vcmask 261120   ;;  %s1789_s3 = smov 96  }
  0x46   : > { %508 = vmatpush.msra.mxu1 %v478_v0  ;;  %v477_v2 = vld [vmem:[#allocation5 + $0x168] sm:$0xff]  ;;  %v472_v3 = vld [vmem:[#allocation5 + $0x140] sm:$0xff]  ;;  %v474_v4 = vld [vmem:[#allocation5 + $0x150] sm:$0xff]  ;;  %s1790_s17 = smov 64   ;;  %s1791_s23 = smov 32   ;;  %vm669_vm1 = vcmask 64512  }
  0x47   : > { %488 = vmatpush.msra.mxu0 %v477_v2  ;;  %v471_v5 = vld [vmem:[#allocation5 + $0x138] sm:$0xff]  ;;  %v469_v6 = vld [vmem:[#allocation5 + $0x128] sm:$0xff]  ;;  %v468_v7 = vld [vmem:[#allocation5 + $0x120] sm:$0xff]  ;;  %vm819_vm2 = vcmask 523264   ;;  %vm821_vm3 = vcmask 785408   ;;  %s1384_s27 = sshll.u32 %s1867_s16, 3 }
  0x48   : > { %509 = vmatpush.msra.mxu1 %v475_v1  ;;  %v466_v8 = vld [vmem:[#allocation5 + $0x110] sm:$0xff]  ;;  %v465_v9 = vld [vmem:[#allocation5 + $0x108] sm:$0xff]  ;;  %v463_v10 = vld [vmem:[#allocation5 + $0xf8] sm:$0xff]  ;;  %s1220_s16 = scalar_lea.sflag [#allocation4], %s1960_s29 }
  0x49   : > { %489 = vmatpush.msra.mxu0 %v474_v4  ;;  %v462_v11 = vld [vmem:[#allocation5 + $0xf0] sm:$0xff]  ;;  %v460_v12 = vld [vmem:[#allocation5 + $0xe0] sm:$0xff]  ;;  %v459_v13 = vld [vmem:[#allocation5 + $0xd8] sm:$0xff] }
  0x4a   : > { %510 = vmatpush.msra.mxu1 %v472_v3  ;;  %v457_v14 = vld [vmem:[#allocation5 + $0xc8] sm:$0xff]  ;;  %v456_v15 = vld [vmem:[#allocation5 + $0xc0] sm:$0xff]  ;;  %v454_v16 = vld [vmem:[#allocation5 + $0xb0] sm:$0xff] }
  0x4b   : > { %490 = vmatpush.msra.mxu0 %v471_v5  ;;  %v453_v17 = vld [vmem:[#allocation5 + $0xa8] sm:$0xff]  ;;  %v451_v18 = vld [vmem:[#allocation5 + $0x98] sm:$0xff]  ;;  %v450_v19 = vld [vmem:[#allocation5 + $0x90] sm:$0xff] }
  0x4c   : > { %511 = vmatpush.msra.mxu1 %v469_v6  ;;  %v448_v20 = vld [vmem:[#allocation5 + $0x80] sm:$0xff]  ;;  %v447_v21 = vld [vmem:[#allocation5 + $0x78] sm:$0xff]  ;;  %v445_v22 = vld [vmem:[#allocation5 + $0x68] sm:$0xff] }
  0x4d   : > { %491 = vmatpush.msra.mxu0 %v468_v7  ;;  %v444_v23 = vld [vmem:[#allocation5 + $0x60] sm:$0xff]  ;;  %v442_v24 = vld [vmem:[#allocation5 + $0x50] sm:$0xff]  ;;  %v441_v25 = vld [vmem:[#allocation5 + $0x48] sm:$0xff] }
  0x4e   : > { %512 = vmatpush.msra.mxu1 %v466_v8  ;;  %v439_v26 = vld [vmem:[#allocation5 + $0x38] sm:$0xff]  ;;  %v438_v27 = vld [vmem:[#allocation5 + $0x30] sm:$0xff]  ;;  %v436_v28 = vld [vmem:[#allocation5 + $0x20] sm:$0xff] }
  0x4f   : > { %492 = vmatpush.msra.mxu0 %v465_v9  ;;  %v435_v29 = vld [vmem:[#allocation5 + $0x18] sm:$0xff]  ;;  %v433_v30 = vld [vmem:[#allocation5 + $0x8] sm:$0xff]  ;;  %v432_v32 = vld [vmem:[#allocation5] sm:$0xff] }
  0x50   : > { %513 = vmatpush.msra.mxu1 %v463_v10  ;;  %v1985_v31 = vld [vmem:[%s1966_s2] sm:$0xff]  ;;  %v476_v34 = vld [vmem:[#allocation5 + $0x160] sm:$0xff]  ;;  %v473_v35 = vld [vmem:[#allocation5 + $0x148] sm:$0xff]  ;;  %s1230_s2 = scalar_lea.hbm %s2100_s9, %s1384_s27 }
  0x51   : > { %493 = vmatpush.msra.mxu0 %v462_v11  ;;  %v479_v33 = vld [vmem:[#allocation5 + $0x178] sm:$0xff]  ;;  %v470_v36 = vld [vmem:[#allocation5 + $0x130] sm:$0xff]  ;;  %v480_v37 = vld [vmem:[#allocation7] sm:$0x7] }
  0x52   : > { %514 = vmatpush.msra.mxu1 %v460_v12  ;;  %528 = vmatpush.msra.mxu2 %v479_v33  ;;  %v483_v38 = vperm.slane %v480_v37, 1  ;;  %v482_v39 = vperm.slane %v480_v37, 0  ;;  %v467_v44 = vld [vmem:[#allocation5 + $0x118] sm:$0xff]  ;;  %v464_v45 = vld [vmem:[#allocation5 + $0x100] sm:$0xff]  ;;  %v461_v46 = vld [vmem:[#allocation5 + $0xe8] sm:$0xff]  ;;  %v484_v62 = vperm.slane %v480_v37, 2 }
  0x53   : > { %494 = vmatpush.msra.mxu0 %v459_v13  ;;  %v458_v47 = vld [vmem:[#allocation5 + $0xd0] sm:$0xff]  ;;  %v455_v48 = vld [vmem:[#allocation5 + $0xb8] sm:$0xff]  ;;  %v452_v49 = vld [vmem:[#allocation5 + $0xa0] sm:$0xff] }
  0x54   : > { %515 = vmatpush.msra.mxu1 %v457_v14  ;;  %529 = vmatpush.msra.mxu2 %v476_v34  ;;  %v449_v50 = vld [vmem:[#allocation5 + $0x88] sm:$0xff]  ;;  %v446_v51 = vld [vmem:[#allocation5 + $0x70] sm:$0xff]  ;;  %v443_v52 = vld [vmem:[#allocation5 + $0x58] sm:$0xff] }
  0x55   : > { %495 = vmatpush.msra.mxu0 %v456_v15  ;;  %v440_v53 = vld [vmem:[#allocation5 + $0x40] sm:$0xff]  ;;  %v437_v54 = vld [vmem:[#allocation5 + $0x28] sm:$0xff]  ;;  %v434_v55 = vld [vmem:[#allocation5 + $0x10] sm:$0xff] }
  0x56   : > { %516 = vmatpush.msra.mxu1 %v454_v16  ;;  %530 = vmatpush.msra.mxu2 %v473_v35 }
  0x57   : > { %496 = vmatpush.msra.mxu0 %v453_v17 }
  0x58   : > { %517 = vmatpush.msra.mxu1 %v451_v18  ;;  %531 = vmatpush.msra.mxu2 %v470_v36 }
  0x59   : > { %497 = vmatpush.msra.mxu0 %v450_v19 }
  0x5a   : > { %518 = vmatpush.msra.mxu1 %v448_v20  ;;  %532 = vmatpush.msra.mxu2 %v467_v44 }
  0x5b   : > { %498 = vmatpush.msra.mxu0 %v447_v21 }
  0x5c   : > { %519 = vmatpush.msra.mxu1 %v445_v22  ;;  %533 = vmatpush.msra.mxu2 %v464_v45  ;;  %v838_v45 = vld [vmem:[#allocation8 + $0x78] sm:$0xff] }
  0x5d   : > { %499 = vmatpush.msra.mxu0 %v444_v23 }
  0x5e   : > { %520 = vmatpush.msra.mxu1 %v442_v24  ;;  %534 = vmatpush.msra.mxu2 %v461_v46  ;;  %v837_v46 = vld [vmem:[#allocation8 + $0x70] sm:$0xff] }
  0x5f   : > { %500 = vmatpush.msra.mxu0 %v441_v25 }
  0x60   : > { %521 = vmatpush.msra.mxu1 %v439_v26  ;;  %535 = vmatpush.msra.mxu2 %v458_v47  ;;  %v836_v47 = vld [vmem:[#allocation8 + $0x68] sm:$0xff] }
  0x61   : > { %501 = vmatpush.msra.mxu0 %v438_v27 }
  0x62   : > { %522 = vmatpush.msra.mxu1 %v436_v28  ;;  %536 = vmatpush.msra.mxu2 %v455_v48  ;;  %v835_v48 = vld [vmem:[#allocation8 + $0x60] sm:$0xff] }
  0x63   : > { %502 = vmatpush.msra.mxu0 %v435_v29 }
  0x64   : > { %523 = vmatpush.msra.mxu1 %v433_v30  ;;  %537 = vmatpush.msra.mxu2 %v452_v49  ;;  %v834_v49 = vld [vmem:[#allocation8 + $0x58] sm:$0xff] }
  0x65   : > { %524 = vmatmul.f32.vlgmr.msra.gmra.mxu1 %v1985_v31  ;;  %503 = vmatpush.msra.mxu0 %v432_v32 }
  0x66   : > { %504 = vmatmul.f32.vlgmr.msra.gmra.mxu0 %v1985_v31  ;;  %538 = vmatpush.msra.mxu2 %v449_v50  ;;  %v833_v50 = vld [vmem:[#allocation8 + $0x50] sm:$0xff] }
  0x68   : > { %539 = vmatpush.msra.mxu2 %v446_v51  ;;  %v832_v51 = vld [vmem:[#allocation8 + $0x48] sm:$0xff] }
  0x6a   : > { %540 = vmatpush.msra.mxu2 %v443_v52  ;;  %v831_v52 = vld [vmem:[#allocation8 + $0x40] sm:$0xff] }
  0x6c   : > { %541 = vmatpush.msra.mxu2 %v440_v53  ;;  %v830_v53 = vld [vmem:[#allocation8 + $0x38] sm:$0xff] }
  0x6e   : > { %542 = vmatpush.msra.mxu2 %v437_v54  ;;  %v829_v54 = vld [vmem:[#allocation8 + $0x30] sm:$0xff] }
  0x70   : > { %543 = vmatpush.msra.mxu2 %v434_v55  ;;  %v828_v55 = vld [vmem:[#allocation8 + $0x28] sm:$0xff] }
  0x71   : > { %544 = vmatmul.f32.vlgmr.msra.gmra.mxu2 %v1985_v31 }
  0xe2   : > { %v525_v40 = vpop.f32.mrf.mxu1 }
  0xe3   : > { %v526_v41 = vadd.f32 %v525_v40, %v483_v38  ;;  %v505_v42 = vpop.f32.mrf.mxu0 }
  0xe4   : > { %v506_v43 = vadd.f32 %v505_v42, %v482_v39 }
  0xe5   : > { %556 = vrot.lane.b32.xlu2 %v526_v41, %s1789_s3  ;;  %558 = vrot.lane.b32.xlu1 %v526_v41, %s1790_s17 }
  0xe6   : > { %560 = vrot.lane.b32.xlu0 %v526_v41, %s1791_s23  ;;  %1371 = vmatpush.xpose.msk.msrb.mxu0 %vm572_vm0, %v526_v41 }
  0xe9   : > { %1372 = vmatmul.msk.f32.vlgmr.msrb.gmra.mxu0 %vm572_vm0, %v506_v43 }
  0xed   : > { %549 = vrot.lane.b32.xlu2 %v506_v43, %s1789_s3  ;;  %551 = vrot.lane.b32.xlu1 %v506_v43, %s1790_s17 }
  0xee   : > { %553 = vrot.lane.b32.xlu0 %v506_v43, %s1791_s23 }
  0xf4   : > { %v545_v63 = vpop.f32.mrf.mxu2 }
  0xf5   : > { %v546_v0 = vadd.f32 %v545_v63, %v484_v62 }
 0x13f   : > { %v557_v56 = vpop.permute.xlu2 %556 }
 0x140   : > { %1373 = vmatpush.xpose.msk.msrb.mxu1 %vm572_vm0, %v557_v56  ;;  %v827_v56 = vld [vmem:[#allocation8 + $0x20] sm:$0xff] }
 0x147   : > { %v550_v57 = vpop.permute.xlu2 %549 }
 0x148   : > { %1374 = vmatmul.msk.f32.vlgmr.msrb.gmra.mxu1 %vm572_vm0, %v550_v57  ;;  %v826_v57 = vld [vmem:[#allocation8 + $0x18] sm:$0xff] }
 0x157   : > { %v559_v58 = vpop.permute.xlu1 %558 }
 0x158   : > { %v561_v59 = vpop.permute.xlu0 %560  ;;  %1375 = vmatpush.xpose.msk.msrb.mxu2 %vm572_vm0, %v559_v58  ;;  %v825_v58 = vld [vmem:[#allocation8 + $0x10] sm:$0xff] }
 0x159   : > { %1377 = vmatpush.xpose.msk.msra.mxu3 %vm572_vm0, %v561_v59  ;;  %v824_v59 = vld [vmem:[#allocation8 + $0x8] sm:$0xff] }
 0x15d   : > { %724 = vmatpush.msrb.mxu3 %v546_v0 }
 0x15f   : > { %v552_v60 = vpop.permute.xlu1 %551 }
 0x160   : > { %v554_v61 = vpop.permute.xlu0 %553  ;;  %1376 = vmatmul.msk.f32.vlgmr.msrb.gmra.mxu2 %vm572_vm0, %v552_v60  ;;  %v823_v60 = vld [vmem:[#allocation8] sm:$0xff] }
 0x161   : > { %1378 = vmatmul.msk.f32.vlgmr.msra.gmra.mxu3 %vm572_vm0, %v554_v61 }
 0x162   : > { %843 = vmatpush.msra.mxu3 %v838_v45  ;;  %v934_v45 = vld [vmem:[#allocation10 + $0x158] sm:$0xff] }
 0x164   : > { %844 = vmatpush.msra.mxu3 %v837_v46  ;;  %v927_v46 = vld [vmem:[#allocation10 + $0x120] sm:$0xff] }
 0x166   : > { %v594_v7 = vpop.f32.mrf.mxu0  ;;  %845 = vmatpush.msra.mxu3 %v836_v47  ;;  %v928_v47 = vld [vmem:[#allocation10 + $0x128] sm:$0xff] }
 0x167   : > { %v670_v8 = vsel %vm669_vm1, %v594_v7, -inf }
 0x168   : > { %846 = vmatpush.msra.mxu3 %v835_v48  ;;  %v929_v48 = vld [vmem:[#allocation10 + $0x130] sm:$0xff] }
 0x16a   : > { %847 = vmatpush.msra.mxu3 %v834_v49  ;;  %v930_v49 = vld [vmem:[#allocation10 + $0x138] sm:$0xff] }
 0x16c   : > { %848 = vmatpush.msra.mxu3 %v833_v50  ;;  %v923_v50 = vld [vmem:[#allocation10 + $0x100] sm:$0xff] }
 0x16e   : > { %849 = vmatpush.msra.mxu3 %v832_v51  ;;  %v924_v51 = vld [vmem:[#allocation10 + $0x108] sm:$0xff] }
 0x170   : > { %850 = vmatpush.msra.mxu3 %v831_v52  ;;  %v925_v52 = vld [vmem:[#allocation10 + $0x110] sm:$0xff] }
 0x172   : > { %851 = vmatpush.msra.mxu3 %v830_v53  ;;  %v926_v53 = vld [vmem:[#allocation10 + $0x118] sm:$0xff] }
 0x174   : > { %852 = vmatpush.msra.mxu3 %v829_v54  ;;  %v919_v54 = vld [vmem:[#allocation10 + $0xe0] sm:$0xff] }
 0x176   : > { %853 = vmatpush.msra.mxu3 %v828_v55  ;;  %v920_v55 = vld [vmem:[#allocation10 + $0xe8] sm:$0xff] }
 0x178   : > { %854 = vmatpush.msra.mxu3 %v827_v56  ;;  %v921_v56 = vld [vmem:[#allocation10 + $0xf0] sm:$0xff] }
 0x17a   : > { %855 = vmatpush.msra.mxu3 %v826_v57  ;;  %v922_v57 = vld [vmem:[#allocation10 + $0xf8] sm:$0xff] }
 0x17c   : > { %856 = vmatpush.msra.mxu3 %v825_v58  ;;  %v915_v58 = vld [vmem:[#allocation10 + $0xc0] sm:$0xff] }
 0x17e   : > { %857 = vmatpush.msra.mxu3 %v824_v59  ;;  %v916_v59 = vld [vmem:[#allocation10 + $0xc8] sm:$0xff] }
 0x180   : > { %858 = vmatpush.msra.mxu3 %v823_v60  ;;  %v917_v60 = vld [vmem:[#allocation10 + $0xd0] sm:$0xff] }
 0x1c5   : > { %v618_v1 = vpop.f32.mrf.mxu1 }
 0x1c6   : > { %v673_v2 = vsel %vm669_vm1, %v618_v1, -inf }
 0x1c7   : > { %674 = vmax.xlane.f32.xlu1 %v673_v2 }
 0x1e0   : > { %566 = vrot.lane.b32.xlu1 %v546_v0, %s1790_s17 }
 0x1e3   : > { %v642_v3 = vpop.f32.mrf.mxu2 }
 0x1e4   : > { %v666_v4 = vpop.f32.mrf.mxu3  ;;  %v676_v5 = vsel %vm669_vm1, %v642_v3, -inf }
 0x1e5   : > { %677 = vmax.xlane.f32.xlu2 %v676_v5  ;;  %v679_v6 = vsel %vm669_vm1, %v666_v4, -inf }
 0x1e6   : > { %680 = vmax.xlane.f32.xlu0 %v679_v6 }
 0x1fa   : > { %563 = vrot.lane.b32.xlu0 %v546_v0, %s1789_s3 }
 0x1fd   : > { %569 = vrot.lane.b32.xlu2 %v546_v0, %s1791_s23 }
 0x224   : > { %671 = vmax.xlane.f32.xlu0 %v670_v8 }
 0x23a   : > { %v675_v9 = vpop.xlane.xlu1 %674 }
 0x23b   : > { %v683_v10 = vsub.f32 %v618_v1, %v675_v9 }
 0x23d   : > { %v688_v11 = vmul.f32 1.442695, %v683_v10 }
 0x23f   : > { %1496 = vpow2.f32 %v688_v11  ;;  %v1792_v11 = vmov 128.0  }
 0x245   : > { %v1497_v12 = vpop.eup %1496 }
 0x246   : > { %v697_v13 = vsel %vm669_vm1, %v1497_v12, 0.0 }
 0x247   : > { %698 = vadd.xlane.f32.xlu2 %v697_v13  ;;  %v952_v13 = vld [vmem:[#allocation10 + $0x1e8] sm:$0xff] }
 0x252   : > { %v567_v14 = vpop.permute.xlu1 %566 }
 0x253   : > { %770 = vmatpush.msra.mxu1 %v567_v14  ;;  %v953_v14 = vld [vmem:[#allocation10 + $0x1f0] sm:$0xff] }
 0x255   : > { %985 = vmatpush.msrb.mxu1 %v952_v13  ;;  %v902_v13 = vld [vmem:[#allocation10 + $0x58] sm:$0xff] }
 0x258   : > { %v678_v15 = vpop.xlane.xlu2 %677 }
 0x259   : > { %v684_v16 = vsub.f32 %v642_v3, %v678_v15  ;;  %v681_v17 = vpop.xlane.xlu0 %680  ;;  %v954_v15 = vld [vmem:[#allocation10 + $0x1f8] sm:$0xff] }
 0x25a   : > { %v685_v18 = vsub.f32 %v666_v4, %v681_v17  ;;  %v948_v17 = vld [vmem:[#allocation10 + $0x1c8] sm:$0xff] }
 0x25b   : > { %v690_v19 = vmul.f32 1.442695, %v684_v16  ;;  %v947_v16 = vld [vmem:[#allocation10 + $0x1c0] sm:$0xff]  ;;  %986 = vmatpush.msrb.mxu1 %v948_v17  ;;  %v898_v17 = vld [vmem:[#allocation10 + $0x38] sm:$0xff] }
 0x25c   : > { %v692_v20 = vmul.f32 1.442695, %v685_v18  ;;  %v949_v18 = vld [vmem:[#allocation10 + $0x1d0] sm:$0xff] }
 0x25d   : > { %1498 = vpow2.f32 %v690_v19  ;;  %v950_v19 = vld [vmem:[#allocation10 + $0x1d8] sm:$0xff] }
 0x25e   : > { %1500 = vpow2.f32 %v692_v20  ;;  %v943_v20 = vld [vmem:[#allocation10 + $0x1a0] sm:$0xff] }
 0x260   : > { %v570_v21 = vpop.permute.xlu2 %569 }
 0x261   : > { %793 = vmatpush.msra.mxu2 %v570_v21  ;;  %v944_v21 = vld [vmem:[#allocation10 + $0x1a8] sm:$0xff] }
 0x262   : > { %987 = vmatpush.msrb.mxu1 %v944_v21  ;;  %v894_v21 = vld [vmem:[#allocation10 + $0x18] sm:$0xff] }
 0x263   : > { %v1499_v22 = vpop.eup %1498  ;;  %1005 = vmatpush.msrb.mxu2 %v953_v14  ;;  %v895_v14 = vld [vmem:[#allocation10 + $0x20] sm:$0xff] }
 0x264   : > { %v1501_v23 = vpop.eup %1500  ;;  %1381 = vmatmul.msk.f32.vlgmr.msra.gmra.mxu1 %vm669_vm1, %v1499_v22  ;;  %v700_v24 = vsel %vm669_vm1, %v1499_v22, 0.0  ;;  %v946_v22 = vld [vmem:[#allocation10 + $0x1b8] sm:$0xff] }
 0x265   : > { %1382 = vmatmul.msk.f32.vlgmr.msra.gmra.mxu2 %vm669_vm1, %v1501_v23  ;;  %701 = vadd.xlane.f32.xlu1 %v700_v24  ;;  %v703_v25 = vsel %vm669_vm1, %v1501_v23, 0.0  ;;  %v939_v24 = vld [vmem:[#allocation10 + $0x180] sm:$0xff] }
 0x266   : > { %704 = vadd.xlane.f32.xlu0 %v703_v25  ;;  %1006 = vmatpush.msrb.mxu2 %v949_v18  ;;  %v940_v25 = vld [vmem:[#allocation10 + $0x188] sm:$0xff]  ;;  %v891_v18 = vld [vmem:[#allocation10] sm:$0xff] }
 0x267   : > { %988 = vmatpush.msrb.mxu1 %v940_v25  ;;  %v1062_v25 = vld [vmem:[#allocation11 + $0x68] sm:$0xff] }
 0x26c   : > { %v564_v26 = vpop.permute.xlu0 %563 }
 0x26d   : > { %747 = vmatpush.msra.mxu0 %v564_v26  ;;  %v941_v26 = vld [vmem:[#allocation10 + $0x190] sm:$0xff] }
 0x26e   : > { %1380 = vmatmul.msk.f32.vlgmr.msra.gmra.mxu0 %vm669_vm1, %v1497_v12  ;;  %v951_v12 = vld [vmem:[#allocation10 + $0x1e0] sm:$0xff] }
 0x26f   : > { %965 = vmatpush.msrb.mxu0 %v951_v12  ;;  %v901_v12 = vld [vmem:[#allocation10 + $0x50] sm:$0xff] }
 0x271   : > { %966 = vmatpush.msrb.mxu0 %v947_v16  ;;  %v897_v16 = vld [vmem:[#allocation10 + $0x30] sm:$0xff] }
 0x273   : > { %967 = vmatpush.msrb.mxu0 %v943_v20  ;;  %v893_v20 = vld [vmem:[#allocation10 + $0x10] sm:$0xff] }
 0x275   : > { %968 = vmatpush.msrb.mxu0 %v939_v24  ;;  %v1079_v24 = vld [vmem:[#allocation11 + $0xf0] sm:$0xff] }
 0x297   : > { %v672_v27 = vpop.xlane.xlu0 %671 }
 0x298   : > { %v682_v28 = vsub.f32 %v594_v7, %v672_v27  ;;  %v1494_v7 = vld [vmem:[%s2095_s4] ss:$0 sm:$0xff]  ;;  %v942_v27 = vld [vmem:[#allocation10 + $0x198] sm:$0xff] }
 0x29a   : > { %v686_v29 = vmul.f32 1.442695, %v682_v28 }
 0x29c   : > { %1502 = vpow2.f32 %v686_v29 }
 0x2a2   : > { %v1503_v30 = vpop.eup %1502 }
 0x2a3   : > { %1379 = vmatmul.msk.f32.vlgmr.msrb.gmra.mxu3 %vm669_vm1, %v1503_v30  ;;  %v694_v32 = vsel %vm669_vm1, %v1503_v30, 0.0 }
 0x2a4   : > { %695 = vadd.xlane.f32.xlu2 %v694_v32  ;;  %1025 = vmatpush.msrb.mxu3 %v954_v15  ;;  %v896_v15 = vld [vmem:[#allocation10 + $0x28] sm:$0xff] }
 0x2a6   : > { %1026 = vmatpush.msrb.mxu3 %v950_v19  ;;  %v892_v19 = vld [vmem:[#allocation10 + $0x8] sm:$0xff] }
 0x2a8   : > { %1027 = vmatpush.msrb.mxu3 %v946_v22  ;;  %v1080_v22 = vld [vmem:[#allocation11 + $0xf8] sm:$0xff] }
 0x2aa   : > { %1028 = vmatpush.msrb.mxu3 %v942_v27  ;;  %v1096_v27 = vld [vmem:[#allocation11 + $0x178] sm:$0xff] }
 0x2ba   : > { %v699_v37 = vpop.xlane.xlu2 %698 }
 0x2d8   : > { %v702_v33 = vpop.xlane.xlu1 %701 }
 0x2d9   : > { %1504 = vrcp.f32 %v702_v33  ;;  %v705_v34 = vpop.xlane.xlu0 %704 }
 0x2da   : > { %1506 = vrcp.f32 %v705_v34 }
 0x2db   : > { %1508 = vrcp.f32 %v699_v37 }
 0x2df   : > { %v1505_v35 = vpop.eup %1504 }
 0x2e0   : > { %v1507_v39 = vpop.eup %1506 }
 0x2e1   : > { %v772_v36 = vpop.f32.mrf.mxu1  ;;  %v1509_v42 = vpop.eup %1508 }
 0x2e2   : > { %v804_v38 = vmul.f32 %v1505_v35, %v772_v36 }
 0x2e4   : > { %811 = vrot.lane.b32.xlu0 %v804_v38, %s1790_s17  ;;  %v935_v38 = vld [vmem:[#allocation10 + $0x160] sm:$0xff] }
 0x2e5   : > { %969 = vmatpush.msrb.mxu0 %v935_v38 }
 0x2e8   : > { %v795_v40 = vpop.f32.mrf.mxu2 }
 0x2e9   : > { %v805_v41 = vmul.f32 %v1507_v39, %v795_v40  ;;  %v936_v39 = vld [vmem:[#allocation10 + $0x168] sm:$0xff]  ;;  %v937_v40 = vld [vmem:[#allocation10 + $0x170] sm:$0xff] }
 0x2ea   : > { %989 = vmatpush.msrb.mxu1 %v936_v39  ;;  %v1060_v39 = vld [vmem:[#allocation11 + $0x58] sm:$0xff] }
 0x2eb   : > { %v749_v43 = vpop.f32.mrf.mxu0  ;;  %815 = vrot.lane.b32.xlu2 %v805_v41, %s1789_s3  ;;  %v938_v41 = vld [vmem:[#allocation10 + $0x178] sm:$0xff]  ;;  %s430_s3 = scalar_lea.vmem [#allocation13], %s1364_s18  ;;  %s1718_s18 = scalar_lea.hbm %s2100_s9, 16 }
 0x2ec   : > { %v803_v44 = vmul.f32 %v1509_v42, %v749_v43  ;;  %1029 = vmatpush.msrb.mxu3 %v938_v41  ;;  %v931_v42 = vld [vmem:[#allocation10 + $0x140] sm:$0xff]  ;;  %v932_v43 = vld [vmem:[#allocation10 + $0x148] sm:$0xff]  ;;  %s1232_s17 = sshll.u32 %s430_s3, 4  ;;  %s1233_s17 = int_to_ptr.vmem [resolvable:$true] %s1232_s17 }
 0x2ed   : > { %970 = vmatpush.msrb.mxu0 %v931_v42  ;;  %990 = vmatpush.msrb.mxu1 %v932_v43  ;;  %v1093_v42 = vld [vmem:[#allocation11 + $0x160] sm:$0xff] }
 0x2ee   : > { %807 = vrot.lane.b32.xlu1 %v803_v44, %s1791_s23  ;;  %v933_v44 = vld [vmem:[#allocation10 + $0x150] sm:$0xff]  ;;  %1030 = vmatpush.msrb.mxu3 %v934_v45  ;;  %v1109_v43 = vld [vmem:[#allocation11 + $0x1e0] sm:$0xff]  ;;  %s1234_s23 = sshll.u32 %s1230_s2, 4  ;;  %s1235_s23 = int_to_ptr.hbm [resolvable:$true] %s1234_s23 }
 0x2ef   : > { %971 = vmatpush.msrb.mxu0 %v927_v46  ;;  %991 = vmatpush.msrb.mxu1 %v928_v47  ;;  %v1075_v45 = vld [vmem:[#allocation11 + $0xd0] sm:$0xff]  ;;  %v1092_v47 = vld [vmem:[#allocation11 + $0x158] sm:$0xff]  ;;  %s1712_s14 = sshra.s32 %s1235_s23, 4  ;;  %s1713_s14 = int_to_ptr.hbm [resolvable:$true] %s1712_s14 }
 0x2f0   : > { %1031 = vmatpush.msrb.mxu3 %v930_v49  ;;  %v1058_v49 = vld [vmem:[#allocation11 + $0x48] sm:$0xff]  ;;  %s1714_s24 = scalar_lea.hbm %s1713_s14, 8  ;;  %p1719_p12 = scmp.lt.s32.totalorder %s1713_s14, %s2100_s9 }
 0x2f1   : > { %972 = vmatpush.msrb.mxu0 %v923_v50  ;;  %992 = vmatpush.msrb.mxu1 %v924_v51  ;;  %v1074_v50 = vld [vmem:[#allocation11 + $0xc8] sm:$0xff]  ;;  %v1091_v51 = vld [vmem:[#allocation11 + $0x150] sm:$0xff]  ;;  %p1715_p1 = scmp.ne.s32.totalorder %s1713_s14, %s1714_s24  ;;  %p1720_p8 = scmp.lt.s32.totalorder %s1718_s18, %s1714_s24 }
 0x2f2   : > { %1032 = vmatpush.msrb.mxu3 %v926_v53  ;;  %v1057_v53 = vld [vmem:[#allocation11 + $0x40] sm:$0xff] }
 0x2f3   : > { %973 = vmatpush.msrb.mxu0 %v919_v54  ;;  %993 = vmatpush.msrb.mxu1 %v920_v55  ;;  %v1073_v54 = vld [vmem:[#allocation11 + $0xc0] sm:$0xff]  ;;  %v1090_v55 = vld [vmem:[#allocation11 + $0x148] sm:$0xff]  ;;  %p1716_p3 = pnand %p1715_p1, %p1929_p13  ;;  %p1721_p7 = por %p1720_p8, %p1719_p12 }
 0x2f4   : > { %1033 = vmatpush.msrb.mxu3 %v922_v57  ;;  %v1056_v57 = vld [vmem:[#allocation11 + $0x38] sm:$0xff] }
 0x2f5   : > { %974 = vmatpush.msrb.mxu0 %v915_v58  ;;  %994 = vmatpush.msrb.mxu1 %v916_v59  ;;  %v1072_v58 = vld [vmem:[#allocation11 + $0xb8] sm:$0xff]  ;;  %v1089_v59 = vld [vmem:[#allocation11 + $0x140] sm:$0xff]  ;;  %p1717_p5 = pneg %p1716_p3 }
 0x2f7   : > { %p1722_p9 = pnand %p1721_p7, %p1717_p5 }
 0x317   : > { %v696_v61 = vpop.xlane.xlu2 %695 }
 0x318   : > { %1510 = vrcp.f32 %v696_v61  ;;  %v918_v61 = vld [vmem:[#allocation10 + $0xd8] sm:$0xff] }
 0x319   : > { %1512 = vrcp.f32 %v1792_v11  ;;  %1034 = vmatpush.msrb.mxu3 %v918_v61  ;;  %v900_v11 = vld [vmem:[#allocation10 + $0x48] sm:$0xff]  ;;  %v1055_v61 = vld [vmem:[#allocation11 + $0x30] sm:$0xff] }
 0x31e   : > { %v1511_v63 = vpop.eup %1510 }
 0x31f   : > { %v1513_v23 = vpop.eup %1512 }
 0x320   : > { %v867_v28 = vmul.f32 128.0, %v1513_v23  ;;  %vm871_vm4 = vweird.f32 %v1513_v23 }
 0x322   : > { %v868_v29 = vsub.f32 1.0, %v867_v28  ;;  %v1061_v28 = vld [vmem:[#allocation11 + $0x60] sm:$0xff] }
 0x324   : > { %v869_v30 = vmul.f32 %v1513_v23, %v868_v29  ;;  %v1112_v29 = vld [vmem:[#allocation11 + $0x1f8] sm:$0xff] }
 0x326   : > { %v726_v62 = vpop.f32.mrf.mxu3  ;;  %v870_v32 = vadd.f32 %v1513_v23, %v869_v30  ;;  %v1077_v30 = vld [vmem:[#allocation11 + $0xe0] sm:$0xff] }
 0x327   : > { %v802_v0 = vmul.f32 %v1511_v63, %v726_v62  ;;  %v911_v62 = vld [vmem:[#allocation10 + $0xa0] sm:$0xff]  ;;  %v912_v63 = vld [vmem:[#allocation10 + $0xa8] sm:$0xff] }
 0x328   : > { %v2027_v33 = vsel %vm871_vm4, %v1513_v23, %v870_v32  ;;  %975 = vmatpush.msrb.mxu0 %v911_v62  ;;  %995 = vmatpush.msrb.mxu1 %v912_v63  ;;  %v1063_v23 = vld [vmem:[#allocation11 + $0x70] sm:$0xff] }
 0x329   : > { %v1095_v32 = vld [vmem:[#allocation11 + $0x170] sm:$0xff] }
 0x32a   : > { %v1071_v62 = vld [vmem:[#allocation11 + $0xb0] sm:$0xff] }
 0x345   : > { %v816_v4 = vpop.permute.xlu2 %815 }
 0x356   : > { %v812_v2 = vpop.permute.xlu0 %811 }
 0x360   : > { %v808_v1 = vpop.permute.xlu1 %807 }
 0x361   : > { %v818_v3 = vsel %vm572_vm0, %v802_v0, %v808_v1  ;;  %v913_v0 = vld [vmem:[#allocation10 + $0xb0] sm:$0xff]  ;;  %v914_v1 = vld [vmem:[#allocation10 + $0xb8] sm:$0xff] }
 0x362   : > { %v820_v5 = vsel %vm819_vm2, %v818_v3, %v812_v2  ;;  %1035 = vmatpush.msrb.mxu3 %v914_v1  ;;  %v907_v2 = vld [vmem:[#allocation10 + $0x80] sm:$0xff]  ;;  %v908_v3 = vld [vmem:[#allocation10 + $0x88] sm:$0xff]  ;;  %v1104_v1 = vld [vmem:[#allocation11 + $0x1b8] sm:$0xff] }
 0x363   : > { %v822_v6 = vsel %vm821_vm3, %v820_v5, %v816_v4  ;;  %v909_v4 = vld [vmem:[#allocation10 + $0x90] sm:$0xff]  ;;  %976 = vmatpush.msrb.mxu0 %v907_v2  ;;  %996 = vmatpush.msrb.mxu1 %v908_v3  ;;  %v910_v5 = vld [vmem:[#allocation10 + $0x98] sm:$0xff]  ;;  %v1054_v3 = vld [vmem:[#allocation11 + $0x28] sm:$0xff] }
 0x364   : > { %859 = vmatmul.f32.vlgmr.msra.gmra.mxu3 %v822_v6  ;;  %v903_v6 = vld [vmem:[#allocation10 + $0x60] sm:$0xff] }
 0x365   : > { %1036 = vmatpush.msrb.mxu3 %v910_v5  ;;  %977 = vmatpush.msrb.mxu0 %v903_v6  ;;  %v1087_v5 = vld [vmem:[#allocation11 + $0x130] sm:$0xff] }
 0x366   : > { %v1103_v6 = vld [vmem:[#allocation11 + $0x1b0] sm:$0xff] }
 0x3e7   : > { %v860_v8 = vpop.f32.mrf.mxu3 }
 0x3e8   : > { %v861_v9 = vadd.f32 %v1494_v7, %v860_v8  ;;  %v904_v7 = vld [vmem:[#allocation10 + $0x68] sm:$0xff]  ;;  %v905_v8 = vld [vmem:[#allocation10 + $0x70] sm:$0xff] }
 0x3e9   : > { %997 = vmatpush.msrb.mxu1 %v904_v7 }
 0x3ea   : > { %v863_v10 = vadd.f32 %v861_v9, %v1985_v31  ;;  %v945_v31 = vld [vmem:[#allocation10 + $0x1b0] sm:$0xff]  ;;  %v906_v9 = vld [vmem:[#allocation10 + $0x78] sm:$0xff] }
 0x3eb   : > { %1007 = vmatpush.msrb.mxu2 %v945_v31  ;;  %1037 = vmatpush.msrb.mxu3 %v906_v9  ;;  %v1064_v31 = vld [vmem:[#allocation11 + $0x78] sm:$0xff]  ;;  %v1069_v9 = vld [vmem:[#allocation11 + $0xa0] sm:$0xff] }
 0x3ec   : > { %864 = vadd.xlane.f32.xlu0 %v863_v10  ;;  %998 = vmatpush.msrb.mxu1 %v900_v11  ;;  %v1052_v11 = vld [vmem:[#allocation11 + $0x18] sm:$0xff] }
 0x3ed   : > { %1008 = vmatpush.msrb.mxu2 %v941_v26  ;;  %1038 = vmatpush.msrb.mxu3 %v902_v13  ;;  %v1078_v26 = vld [vmem:[#allocation11 + $0xe8] sm:$0xff] }
 0x3ee   : > { %999 = vmatpush.msrb.mxu1 %v896_v15 }
 0x3ef   : > { %1009 = vmatpush.msrb.mxu2 %v937_v40  ;;  %1039 = vmatpush.msrb.mxu3 %v898_v17  ;;  %v1076_v40 = vld [vmem:[#allocation11 + $0xd8] sm:$0xff]  ;;  %v1051_v17 = vld [vmem:[#allocation11 + $0x10] sm:$0xff] }
 0x3f0   : > { %1000 = vmatpush.msrb.mxu1 %v892_v19  ;;  %v1086_v19 = vld [vmem:[#allocation11 + $0x128] sm:$0xff] }
 0x3f1   : > { %1010 = vmatpush.msrb.mxu2 %v933_v44  ;;  %1040 = vmatpush.msrb.mxu3 %v894_v21  ;;  %v1059_v44 = vld [vmem:[#allocation11 + $0x50] sm:$0xff]  ;;  %v1050_v21 = vld [vmem:[#allocation11 + $0x8] sm:$0xff] }
 0x3f2   : > { %1137 = vmatpush.msra.mxu1 %v1080_v22  ;;  %v1101_v22 = vld [vmem:[#allocation11 + $0x1a0] sm:$0xff] }
 0x3f3   : > { %1011 = vmatpush.msrb.mxu2 %v929_v48  ;;  %1177 = vmatpush.msra.mxu3 %v1112_v29  ;;  %v1108_v48 = vld [vmem:[#allocation11 + $0x1d8] sm:$0xff]  ;;  %v1082_v29 = vld [vmem:[#allocation11 + $0x108] sm:$0xff] }
 0x3f4   : > { %1138 = vmatpush.msra.mxu1 %v1079_v24  ;;  %v1065_v24 = vld [vmem:[#allocation11 + $0x80] sm:$0xff] }
 0x3f5   : > { %1012 = vmatpush.msrb.mxu2 %v925_v52  ;;  %v1107_v52 = vld [vmem:[#allocation11 + $0x1d0] sm:$0xff] }
 0x3f6   : > { %1139 = vmatpush.msra.mxu1 %v1078_v26  ;;  %v1100_v26 = vld [vmem:[#allocation11 + $0x198] sm:$0xff] }
 0x3f7   : > { %1013 = vmatpush.msrb.mxu2 %v921_v56  ;;  %v1106_v56 = vld [vmem:[#allocation11 + $0x1c8] sm:$0xff] }
 0x3f8   : > { %1140 = vmatpush.msra.mxu1 %v1077_v30  ;;  %v1098_v30 = vld [vmem:[#allocation11 + $0x188] sm:$0xff] }
 0x3f9   : > { %1014 = vmatpush.msrb.mxu2 %v917_v60  ;;  %v1105_v60 = vld [vmem:[#allocation11 + $0x1c0] sm:$0xff] }
 0x3fa   : > { %1141 = vmatpush.msra.mxu1 %v1076_v40 }
 0x3fb   : > { %1015 = vmatpush.msrb.mxu2 %v913_v0  ;;  %v1088_v0 = vld [vmem:[#allocation11 + $0x138] sm:$0xff] }
 0x3fc   : > { %1142 = vmatpush.msra.mxu1 %v1075_v45 }
 0x3fd   : > { %1016 = vmatpush.msrb.mxu2 %v909_v4  ;;  %v1070_v4 = vld [vmem:[#allocation11 + $0xa8] sm:$0xff] }
 0x3fe   : > { %1143 = vmatpush.msra.mxu1 %v1074_v50 }
 0x3ff   : > { %1017 = vmatpush.msrb.mxu2 %v905_v8  ;;  %v1053_v8 = vld [vmem:[#allocation11 + $0x20] sm:$0xff] }
 0x400   : > { %1144 = vmatpush.msra.mxu1 %v1073_v54 }
 0x401   : > { %1018 = vmatpush.msrb.mxu2 %v901_v12  ;;  %v1068_v12 = vld [vmem:[#allocation11 + $0x98] sm:$0xff] }
 0x402   : > { %1145 = vmatpush.msra.mxu1 %v1072_v58 }
 0x403   : > { %1019 = vmatpush.msrb.mxu2 %v897_v16 }
 0x404   : > { %1146 = vmatpush.msra.mxu1 %v1071_v62 }
 0x405   : > { %1020 = vmatpush.msrb.mxu2 %v893_v20  ;;  %v1102_v20 = vld [vmem:[#allocation11 + $0x1a8] sm:$0xff] }
 0x406   : > { %1147 = vmatpush.msra.mxu1 %v1070_v4 }
 0x407   : > { %1157 = vmatpush.msra.mxu2 %v1096_v27  ;;  %v1083_v27 = vld [vmem:[#allocation11 + $0x110] sm:$0xff] }
 0x408   : > { %1148 = vmatpush.msra.mxu1 %v1069_v9 }
 0x409   : > { %1158 = vmatpush.msra.mxu2 %v1095_v32  ;;  %v1081_v32 = vld [vmem:[#allocation11 + $0x100] sm:$0xff] }
 0x40a   : > { %1149 = vmatpush.msra.mxu1 %v1068_v12 }
 0x45f   : > { %v865_v34 = vpop.xlane.xlu0 %864 }
 0x460   : > { %v873_v35 = vmul.f32 %v2027_v33, %v865_v34  ;;  %v1111_v34 = vld [vmem:[#allocation11 + $0x1f0] sm:$0xff] }
 0x461   : > { %1178 = vmatpush.msra.mxu3 %v1111_v34  ;;  %v1097_v34 = vld [vmem:[#allocation11 + $0x180] sm:$0xff] }
 0x462   : > { %v2030_v36 = vsub.f32 %v863_v10, %v873_v35  ;;  %v899_v10 = vld [vmem:[#allocation10 + $0x40] sm:$0xff]  ;;  %v1094_v35 = vld [vmem:[#allocation11 + $0x168] sm:$0xff] }
 0x463   : > { %978 = vmatpush.msrb.mxu0 %v899_v10  ;;  %1159 = vmatpush.msra.mxu2 %v1094_v35  ;;  %v955_v35 = vld [vmem:[%s2097_s6] sm:$0xf] }
 0x464   : > { %v875_v37 = vmul.f32 %v2030_v36, %v2030_v36  ;;  %v959_v45 = vperm.slane %v955_v35, 2 }
 0x465   : > { %979 = vmatpush.msrb.mxu0 %v895_v14  ;;  %1160 = vmatpush.msra.mxu2 %v1093_v42 }
 0x466   : > { %876 = vadd.xlane.f32.xlu1 %v875_v37  ;;  %v1110_v37 = vld [vmem:[#allocation11 + $0x1e8] sm:$0xff] }
 0x467   : > { %980 = vmatpush.msrb.mxu0 %v891_v18  ;;  %1179 = vmatpush.msra.mxu3 %v1110_v37  ;;  %v1067_v18 = vld [vmem:[#allocation11 + $0x90] sm:$0xff]  ;;  %v957_v37 = vperm.slane %v955_v35, 0 }
 0x468   : > { %1161 = vmatpush.msra.mxu2 %v1092_v47  ;;  %1150 = vmatpush.msra.mxu1 %v1067_v18 }
 0x469   : > { %1117 = vmatpush.msra.mxu0 %v1064_v31  ;;  %1180 = vmatpush.msra.mxu3 %v1109_v43  ;;  %v1066_v31 = vld [vmem:[#allocation11 + $0x88] sm:$0xff] }
 0x46a   : > { %1162 = vmatpush.msra.mxu2 %v1091_v51  ;;  %1151 = vmatpush.msra.mxu1 %v1066_v31 }
 0x46b   : > { %1118 = vmatpush.msra.mxu0 %v1063_v23  ;;  %1181 = vmatpush.msra.mxu3 %v1108_v48  ;;  %v1049_v23 = vld [vmem:[#allocation11] sm:$0xff] }
 0x46c   : > { %1163 = vmatpush.msra.mxu2 %v1090_v55  ;;  %1152 = vmatpush.msra.mxu1 %v1065_v24 }
 0x46d   : > { %1119 = vmatpush.msra.mxu0 %v1062_v25  ;;  %1182 = vmatpush.msra.mxu3 %v1107_v52  ;;  %v1084_v25 = vld [vmem:[#allocation11 + $0x118] sm:$0xff] }
 0x46e   : > { %1164 = vmatpush.msra.mxu2 %v1089_v59 }
 0x46f   : > { %1120 = vmatpush.msra.mxu0 %v1061_v28  ;;  %1183 = vmatpush.msra.mxu3 %v1106_v56  ;;  %v1099_v28 = vld [vmem:[#allocation11 + $0x190] sm:$0xff] }
 0x470   : > { %1165 = vmatpush.msra.mxu2 %v1088_v0 }
 0x471   : > { %1121 = vmatpush.msra.mxu0 %v1060_v39  ;;  %1184 = vmatpush.msra.mxu3 %v1105_v60 }
 0x472   : > { %1166 = vmatpush.msra.mxu2 %v1087_v5 }
 0x473   : > { %1122 = vmatpush.msra.mxu0 %v1059_v44  ;;  %1185 = vmatpush.msra.mxu3 %v1104_v1 }
 0x474   : > { %1167 = vmatpush.msra.mxu2 %v1086_v19 }
 0x475   : > { %1123 = vmatpush.msra.mxu0 %v1058_v49  ;;  %1186 = vmatpush.msra.mxu3 %v1103_v6 }
 0x477   : > { %1124 = vmatpush.msra.mxu0 %v1057_v53  ;;  %1187 = vmatpush.msra.mxu3 %v1102_v20  ;;  %v1495_v53 = vld [vmem:[%s2099_s8] ss:$0 sm:$0xff] }
 0x479   : > { %1125 = vmatpush.msra.mxu0 %v1056_v57  ;;  %1188 = vmatpush.msra.mxu3 %v1101_v22 }
 0x47b   : > { %1126 = vmatpush.msra.mxu0 %v1055_v61  ;;  %1189 = vmatpush.msra.mxu3 %v1100_v26 }
 0x47d   : > { %1127 = vmatpush.msra.mxu0 %v1054_v3  ;;  %1190 = vmatpush.msra.mxu3 %v1099_v28 }
 0x47f   : > { %1128 = vmatpush.msra.mxu0 %v1053_v8  ;;  %1191 = vmatpush.msra.mxu3 %v1098_v30 }
 0x481   : > { %1129 = vmatpush.msra.mxu0 %v1052_v11  ;;  %1192 = vmatpush.msra.mxu3 %v1097_v34 }
 0x483   : > { %1130 = vmatpush.msra.mxu0 %v1051_v17 }
 0x485   : > { %1131 = vmatpush.msra.mxu0 %v1050_v21 }
 0x487   : > { %1132 = vmatpush.msra.mxu0 %v1049_v23 }
 0x4d9   : > { %v877_v38 = vpop.xlane.xlu1 %876 }
 0x4da   : > { %v878_v41 = vmul.f32 %v877_v38, %v2027_v33  ;;  %v958_v38 = vperm.slane %v955_v35, 1 }
 0x4dc   : > { %v2035_v46 = vadd.f32 1e-05, %v878_v41 }
 0x4de   : > { %1514 = vrsqrt.f32 %v2035_v46  ;;  %vm886_vm6 = vweird.f32 %v2035_v46 }
 0x4e4   : > { %v1515_v63 = vpop.eup %1514 }
 0x4e5   : > { %v881_v2 = vmul.f32 %v1515_v63, %v2035_v46  ;;  %vm887_vm5 = vweird.f32 %v1515_v63  ;;  %v960_v46 = vperm.slane %v955_v35, 3 }
 0x4e6   : > { %vm888_vm7 = vmor %vm886_vm6, %vm887_vm5 }
 0x4e7   : > { %v882_v7 = vmul.f32 %v1515_v63, %v881_v2 }
 0x4e9   : > { %v883_v10 = vmul.f32 0.5, %v882_v7 }
 0x4eb   : > { %v884_v13 = vsub.f32 1.5, %v883_v10 }
 0x4ed   : > { %v885_v14 = vmul.f32 %v1515_v63, %v884_v13 }
 0x4ef   : > { %v889_v15 = vsel %vm888_vm7, %v1515_v63, %v885_v14 }
 0x4f0   : > { %v2041_v16 = vmul.f32 %v889_v15, %v2030_v36  ;;  %v1085_v36 = vld [vmem:[#allocation11 + $0x120] sm:$0xff] }
 0x4f1   : > { %1168 = vmatpush.msra.mxu2 %v1085_v36 }
 0x4f2   : > { %981 = vmatmul.f32.vlgmr.msrb.gmra.mxu0 %v2041_v16  ;;  %1001 = vmatmul.f32.vlgmr.msrb.gmra.mxu1 %v2041_v16 }
 0x4f3   : > { %1021 = vmatmul.f32.vlgmr.msrb.gmra.mxu2 %v2041_v16  ;;  %1041 = vmatmul.f32.vlgmr.msrb.gmra.mxu3 %v2041_v16 }
 0x4f4   : > { %1169 = vmatpush.msra.mxu2 %v1084_v25 }
 0x4f6   : > { %1170 = vmatpush.msra.mxu2 %v1083_v27 }
 0x4f8   : > { %1171 = vmatpush.msra.mxu2 %v1082_v29 }
 0x4fa   : > { %1172 = vmatpush.msra.mxu2 %v1081_v32 }
 0x56f   : > { %v982_v39 = vpop.f32.mrf.mxu0  ;;  %v1002_v40 = vpop.f32.mrf.mxu1 }
 0x570   : > { %v983_v41 = vadd.f32 %v982_v39, %v957_v37  ;;  %v1003_v42 = vadd.f32 %v1002_v40, %v958_v38 }
 0x572   : > { %v1045_v43 = vmax.f32 %v983_v41, 0.0  ;;  %v1046_v44 = vmax.f32 %v1003_v42, 0.0 }
 0x574   : > { %1133 = vmatmul.f32.vlgmr.msra.gmra.mxu0 %v1045_v43  ;;  %1153 = vmatmul.f32.vlgmr.msra.gmra.mxu1 %v1046_v44 }
 0x576   : > { %v1022_v47 = vpop.f32.mrf.mxu2  ;;  %v1042_v48 = vpop.f32.mrf.mxu3 }
 0x577   : > { %v1023_v49 = vadd.f32 %v1022_v47, %v959_v45  ;;  %v1043_v50 = vadd.f32 %v1042_v48, %v960_v46 }
 0x579   : > { %v1047_v51 = vmax.f32 %v1023_v49, 0.0  ;;  %v1048_v52 = vmax.f32 %v1043_v50, 0.0 }
 0x57b   : > { %1173 = vmatmul.f32.vlgmr.msra.gmra.mxu2 %v1047_v51  ;;  %1193 = vmatmul.f32.vlgmr.msra.gmra.mxu3 %v1048_v52 }
 0x5f1   : > { %v1134_v54 = vpop.f32.mrf.mxu0  ;;  %v1154_v56 = vpop.f32.mrf.mxu1 }
 0x5f2   : > { %v1135_v55 = vadd.f32 %v1495_v53, %v1134_v54 }
 0x5f4   : > { %v1155_v57 = vadd.f32 %v1154_v56, %v1135_v55 }
 0x5fe   : > { %v1174_v58 = vpop.f32.mrf.mxu2  ;;  %v1194_v60 = vpop.f32.mrf.mxu3 }
 0x5ff   : > { %v1175_v59 = vadd.f32 %v1174_v58, %v1155_v57 }
 0x601   : > { %v1195_v61 = vadd.f32 %v1194_v60, %v1175_v59 }
 0x603   : > { %v1197_v62 = vadd.f32 %v1195_v61, %v2041_v16 }
 0x605   : > { %1198 = vadd.xlane.f32.xlu2 %v1197_v62 }
 0x678   : > { %v1199_v63 = vpop.xlane.xlu2 %1198 }
 0x679   : > { %v1200_v0 = vmul.f32 %v1199_v63, %v2027_v33 }
 0x67b   : > { %v1201_v1 = vsub.f32 %v1197_v62, %v1200_v0 }
 0x67d   : > { %v1202_v2 = vmul.f32 %v1201_v1, %v1201_v1 }
 0x67f   : > { %1203 = vadd.xlane.f32.xlu0 %v1202_v2 }
 0x6f2   : > { %v1204_v3 = vpop.xlane.xlu0 %1203 }
 0x6f3   : > { %v1205_v4 = vmul.f32 %v1204_v3, %v2027_v33 }
 0x6f5   : > { %v1206_v5 = vadd.f32 1e-05, %v1205_v4 }
 0x6f7   : > { %1516 = vrsqrt.f32 %v1206_v5  ;;  %vm1213_vm9 = vweird.f32 %v1206_v5 }
 0x6fd   : > { %v1517_v6 = vpop.eup %1516 }
 0x6fe   : > { %v1208_v7 = vmul.f32 %v1517_v6, %v1206_v5  ;;  %vm1214_vm8 = vweird.f32 %v1517_v6 }
 0x6ff   : > { %vm1215_vm10 = vmor %vm1213_vm9, %vm1214_vm8 }
 0x700   : > { %v1209_v8 = vmul.f32 %v1517_v6, %v1208_v7 }
 0x702   : > { %v1210_v9 = vmul.f32 0.5, %v1209_v8 }
 0x704   : > { %v1211_v10 = vsub.f32 1.5, %v1210_v9 }
 0x706   : > { %v1212_v11 = vmul.f32 %v1517_v6, %v1211_v10 }
 0x708   : > { %v1216_v33 = vsel %vm1215_vm10, %v1517_v6, %v1212_v11 }
 0x709   : > { %v1217_v12 = vmul.f32 %v1216_v33, %v1201_v1 }
 0x70b   : > { %1218 = vst [vmem:[%s430_s3] sm:$0xff] %v1217_v12 }
 0x70c   : > { %1725 = shalt.err (!%p1722_p9)
}
 0x70d   : > { %1409 = dma.vmem_to_hbm [thread:$0]  (%p1929_p13), %s1233_s17, 128, %s1235_s23, %s1220_s16  }
 0x70e PF: > { %s1246_s29 = sand.u32 1, %s1764_s30   ;;  %p2113_p10 = scmp.ge.s32.totalorder %s1776_s12, 2 }
 0x70f   : > { %s1247_s27 = scalar_lea.sflag [#allocation4], %s1246_s29 }
 0x710   : > { %p1432_p11 = pnand %p2113_p10, %p1934_p4 }
 0x712   : > { %p1433_p0 = pneg %p1432_p11 }
 0x714   : > { %1759 = dma.done.wait (%p1433_p0), %s1247_s27, 128  }
 0x715   : > { %1761 = vsyncadd (%p1433_p0), %s1247_s27, 4294967168  ;;  %p25_p2 = scmp.ge.s32.totalorder %s1909_s21, 4   ;;  %s2114_s30 = smov %s1768_s10 }
 0x716   : > { %s2115_s10 = smov %s1772_s11  ;;  %s2116_s11 = smov %s1921_s19 }
 0x717   : > { %s2117_s12 = smov %s1909_s21  ;;  %27 = sbr.rel (!%p25_p2) target bundleno = 12 (0xc), region = 121 }
 0x71c   :  { %1253 = vsyncpa [#allocation3], 1 }
 0x71d   :  { %1255 = vsyncpa [#allocation3 + $0x1], 1 }
 0x71e   :  { %1256 = vsyncpa [#allocation6], 1 }
 0x71f   :  { %1257 = vsyncpa [#allocation9], 1 }
 0x720   :  { %1258 = vsyncpa [#allocation12], 1 }
 0x721   :  { %1259 = vsyncpa [#allocation4], 1 }
 0x722   :  { %1261 = vsyncpa [#allocation4 + $0x1], 1 }

</bundles_post_ra>
